<compile_context>
chip_gen: v5e
topology: v5e:2x2
jax: 0.10.0
libtpu: 0.0.40
codegen_flags: <defaults>
</compile_context>

<pallas_src>
import functools
import math

import jax
import jax.numpy as jnp
from jax.experimental import pallas as pl
from jax.experimental.pallas import tpu as pltpu

EPS = 1e-5  # PyTorch LayerNorm default eps


def _layer_norm(x, w, b):
    mu = jnp.mean(x, axis=-1, keepdims=True)
    var = jnp.mean((x - mu) ** 2, axis=-1, keepdims=True)
    return (x - mu) * jax.lax.rsqrt(var + EPS) * w + b


def encoder_layer_kernel(x_ref, wqkv_ref, bqkv_ref, wo_ref, bo_ref,
                         ln1w_ref, ln1b_ref, ln2w_ref, ln2b_ref,
                         w1_ref, b1_ref, w2_ref, b2_ref,
                         out_ref, h_scr, *, num_heads, seq_len, batch_tile):
    """One post-norm encoder layer for one batch tile. grid = (batch_tiles, layers)."""
    layer = pl.program_id(1)
    num_layers = pl.num_programs(1)
    TB, S, H = batch_tile, seq_len, num_heads
    M, E = h_scr.shape            # M = TB * S
    Dh = E // H

    @pl.when(layer == 0)
    def _():
        # New batch tile: load the activation into the VMEM carry (f32, layer-resident).
        h_scr[...] = x_ref[...].reshape(M, E).astype(jnp.float32)

    h = h_scr[...]

    # ---- self-attention; 1/sqrt(Dh) is already folded into the Q weights/bias ----
    qkv = jnp.dot(h.astype(jnp.bfloat16), wqkv_ref[0],
                  preferred_element_type=jnp.float32) + bqkv_ref[0]        # (M, 3E) f32

    def to_heads(t):              # (M, E) -> (TB*H, S, Dh) head-major batched layout
        return t.reshape(TB, S, H, Dh).transpose(0, 2, 1, 3).reshape(TB * H, S, Dh)

    q = to_heads(qkv[:, 0 * E:1 * E]).astype(jnp.bfloat16)
    k = to_heads(qkv[:, 1 * E:2 * E]).astype(jnp.bfloat16)
    v = to_heads(qkv[:, 2 * E:3 * E]).astype(jnp.bfloat16)

    s = jnp.einsum('bqd,bkd->bqk', q, k,
                   preferred_element_type=jnp.float32)                     # (TB*H, S, S)
    s = s - jnp.max(s, axis=-1, keepdims=True)
    p = jnp.exp(s)
    p = p * pl.reciprocal(jnp.sum(p, axis=-1, keepdims=True), approx=True)
    o = jnp.einsum('bqk,bkd->bqd', p.astype(jnp.bfloat16), v,
                   preferred_element_type=jnp.float32)                     # (TB*H, S, Dh)
    o = o.reshape(TB, H, S, Dh).transpose(0, 2, 1, 3).reshape(M, E)
    # TODO(synk): for long sequences add a kv grid axis and switch to a flash-style
    #             online softmax so the f32 score tensor stays O(H*tq*tk) in VMEM.
    attn = jnp.dot(o.astype(jnp.bfloat16), wo_ref[0],
                   preferred_element_type=jnp.float32) + bo_ref[0]

    # ---- residual + LayerNorm1 (post-norm) ----
    h1 = _layer_norm(h + attn, ln1w_ref[0], ln1b_ref[0])

    # ---- feedforward: linear1 -> relu -> linear2 ----
    f = jnp.dot(h1.astype(jnp.bfloat16), w1_ref[0],
                preferred_element_type=jnp.float32) + b1_ref[0]
    f = jnp.maximum(f, 0.0)
    f = jnp.dot(f.astype(jnp.bfloat16), w2_ref[0],
                preferred_element_type=jnp.float32) + b2_ref[0]

    # ---- residual + LayerNorm2, write back the layer carry ----
    h_scr[...] = _layer_norm(h1 + f, ln2w_ref[0], ln2b_ref[0])

    @pl.when(layer == num_layers - 1)
    def _():
        out_ref[...] = h_scr[...].reshape(TB, S, E).astype(out_ref.dtype)


def _pick_batch_tile(batch, seq, target_rows=256):
    """Rows per grid step for MXU-shaped matmuls, while keeping >=2 parallel grid
    steps whenever possible so both v7x TensorCores get work."""
    tb = max(1, min(batch, target_rows // max(seq, 1)))
    if batch >= 2:
        tb = min(tb, batch // 2)
    while batch % tb:
        tb -= 1
    return max(tb, 1)


def pack_params(layer_params, num_heads):
    """One-time weight packing (call once, reuse across steps):
    pre-transpose PyTorch (out,in) Linear weights to (in,out), fold the 1/sqrt(Dh)
    attention scale into the Q projection, cast matmul weights to bf16, and stack
    along a leading layer axis so the kernel streams one layer per grid step."""
    E = layer_params[0]['wo'].shape[0]
    FF = layer_params[0]['w1'].shape[0]
    assert E % num_heads == 0, "embed_dim must be divisible by num_heads"
    scale = 1.0 / math.sqrt(E // num_heads)
    col_scale = jnp.concatenate([jnp.full((E,), scale, jnp.float32),
                                 jnp.ones((2 * E,), jnp.float32)])

    def stack(fn):
        return jnp.stack([fn(p) for p in layer_params])

    return dict(
        wqkv=stack(lambda p: p['wqkv'].T * col_scale[None, :]).astype(jnp.bfloat16),
        bqkv=stack(lambda p: p['bqkv'].reshape(1, 3 * E) * col_scale[None, :]),
        wo=stack(lambda p: p['wo'].T).astype(jnp.bfloat16),
        bo=stack(lambda p: p['bo'].reshape(1, E)),
        ln1w=stack(lambda p: p['ln1w'].reshape(1, E)),
        ln1b=stack(lambda p: p['ln1b'].reshape(1, E)),
        ln2w=stack(lambda p: p['ln2w'].reshape(1, E)),
        ln2b=stack(lambda p: p['ln2b'].reshape(1, E)),
        w1=stack(lambda p: p['w1'].T).astype(jnp.bfloat16),
        b1=stack(lambda p: p['b1'].reshape(1, FF)),
        w2=stack(lambda p: p['w2'].T).astype(jnp.bfloat16),
        b2=stack(lambda p: p['b2'].reshape(1, E)),
    )


def transformer_encoder(x, packed, num_heads, batch_tile=None):
    """x: (B, S, E) f32. packed: output of pack_params()."""
    B, S, E = x.shape
    assert E % num_heads == 0, "embed_dim must be divisible by num_heads"
    L = packed['wqkv'].shape[0]
    FF = packed['w1'].shape[2]
    TB = _pick_batch_tile(B, S) if batch_tile is None else batch_tile
    assert B % TB == 0
    Bt = B // TB
    M, H = TB * S, num_heads

    def xmap(b, l):   # activation blocks: constant across the layer axis (no re-DMA)
        return (b, 0, 0)

    def wmap(b, l):   # per-layer weights: streamed & double-buffered one layer ahead
        return (l, 0, 0)

    in_specs = [
        pl.BlockSpec((TB, S, E), xmap),          # x
        pl.BlockSpec((1, E, 3 * E), wmap),       # wqkv
        pl.BlockSpec((1, 1, 3 * E), wmap),       # bqkv
        pl.BlockSpec((1, E, E), wmap),           # wo
        pl.BlockSpec((1, 1, E), wmap),           # bo
        pl.BlockSpec((1, 1, E), wmap),           # ln1w
        pl.BlockSpec((1, 1, E), wmap),           # ln1b
        pl.BlockSpec((1, 1, E), wmap),           # ln2w
        pl.BlockSpec((1, 1, E), wmap),           # ln2b
        pl.BlockSpec((1, E, FF), wmap),          # w1
        pl.BlockSpec((1, 1, FF), wmap),          # b1
        pl.BlockSpec((1, FF, E), wmap),          # w2
        pl.BlockSpec((1, 1, E), wmap),           # b2
    ]
    args = (x, packed['wqkv'], packed['bqkv'], packed['wo'], packed['bo'],
            packed['ln1w'], packed['ln1b'], packed['ln2w'], packed['ln2b'],
            packed['w1'], packed['b1'], packed['w2'], packed['b2'])

    # VMEM budget: double-buffered per-layer weights + x/out blocks + carry + temporaries.
    layer_w = 2 * (E * 3 * E + E * E + 2 * E * FF)            # bf16 matmul weights
    layer_b = 4 * (3 * E + 6 * E + FF)                        # f32 biases / LN params
    acts = 4 * (2 * 2 * TB * S * E + M * E)                   # x/out double-buffered + carry
    temps = 4 * (M * 3 * E + TB * H * S * S + M * FF + 4 * M * E)
    footprint = 2 * (layer_w + layer_b) + acts + temps
    vmem_limit = int(min(64 * 2**20, max(2 * footprint, 32 * 2**20)))

    kernel = functools.partial(encoder_layer_kernel, num_heads=num_heads,
                               seq_len=S, batch_tile=TB)
    return pl.pallas_call(
        kernel,
        out_shape=jax.ShapeDtypeStruct((B, S, E), x.dtype),
        grid=(Bt, L),
        in_specs=in_specs,
        out_specs=pl.BlockSpec((TB, S, E), xmap),
        scratch_shapes=[pltpu.VMEM((M, E), jnp.float32)],     # cross-layer activation carry
        compiler_params=pltpu.CompilerParams(
            dimension_semantics=("parallel", "arbitrary"),
            vmem_limit_bytes=vmem_limit),
    )(*args)


def init_layer_params(key, embed_dim, ff_dim):
    """Parameters in PyTorch conventions: Linear weights are (out_features, in_features)."""
    ks = jax.random.split(key, 6)
    s = 0.05
    return dict(
        wqkv=jax.random.normal(ks[0], (3 * embed_dim, embed_dim), jnp.float32) * s,
        bqkv=jax.random.normal(ks[1], (3 * embed_dim,), jnp.float32) * s,
        wo=jax.random.normal(ks[2], (embed_dim, embed_dim), jnp.float32) * s,
        bo=jax.random.normal(ks[3], (embed_dim,), jnp.float32) * s,
        ln1w=jnp.ones((embed_dim,), jnp.float32),
        ln1b=jnp.zeros((embed_dim,), jnp.float32),
        ln2w=jnp.ones((embed_dim,), jnp.float32),
        ln2b=jnp.zeros((embed_dim,), jnp.float32),
        w1=jax.random.normal(ks[4], (ff_dim, embed_dim), jnp.float32) * s,
        b1=jnp.zeros((ff_dim,), jnp.float32),
        w2=jax.random.normal(ks[5], (embed_dim, ff_dim), jnp.float32) * s,
        b2=jnp.zeros((embed_dim,), jnp.float32),
    )


def reference_encoder(x, layer_params, num_heads):
    """Pure-JAX f32 reference matching PyTorch TransformerEncoder (post-norm, relu, eval)."""
    E = x.shape[-1]
    H = num_heads
    Dh = E // H
    h = x
    for prm in layer_params:
        B, S, _ = h.shape
        qkv = h @ prm['wqkv'].T + prm['bqkv']
        q, k, v = jnp.split(qkv, 3, axis=-1)
        q = q.reshape(B, S, H, Dh).transpose(0, 2, 1, 3) / math.sqrt(Dh)
        k = k.reshape(B, S, H, Dh).transpose(0, 2, 1, 3)
        v = v.reshape(B, S, H, Dh).transpose(0, 2, 1, 3)
        a = jax.nn.softmax(jnp.einsum('bhqd,bhkd->bhqk', q, k), axis=-1)
        o = jnp.einsum('bhqk,bhkd->bhqd', a, v).transpose(0, 2, 1, 3).reshape(B, S, E)
        h1 = h + (o @ prm['wo'].T + prm['bo'])
        h1 = ((h1 - h1.mean(-1, keepdims=True))
              / jnp.sqrt(h1.var(-1, keepdims=True) + EPS) * prm['ln1w'] + prm['ln1b'])
        f = jnp.maximum(h1 @ prm['w1'].T + prm['b1'], 0.0) @ prm['w2'].T + prm['b2']
        h2 = h1 + f
        h = ((h2 - h2.mean(-1, keepdims=True))
             / jnp.sqrt(h2.var(-1, keepdims=True) + EPS) * prm['ln2w'] + prm['ln2b'])
    return h


if __name__ == "__main__":
    # embed_dim=32, num_heads=4, feedforward_dim=64, num_layers=2, dropout inactive (eval).
    B, S, E, H, FF, L = 2, 8, 32, 4, 64, 2

    key = jax.random.PRNGKey(0)
    kx, kp = jax.random.split(key)
    x = jax.random.normal(kx, (B, S, E), jnp.float32)
    params = [init_layer_params(k, E, FF) for k in jax.random.split(kp, L)]

    packed = pack_params(params, H)                    # pack/transpose/cast weights ONCE
    encode = jax.jit(functools.partial(transformer_encoder, num_heads=H))

    y = jax.block_until_ready(encode(x, packed))

    assert y.shape == (B, S, E), y.shape
    assert bool(jnp.all(jnp.isfinite(y)))
    y_ref = reference_encoder(x, params, H)
    err = float(jnp.max(jnp.abs(y - y_ref)))
    assert err < 0.2, f"max abs error vs pure-JAX reference: {err}"
    print("KERNEL_OK")
</pallas_src>

<mosaic_0001>
module attributes {stable_mosaic.version = 11 : i64} {
  func.func @encoder_layer_kernel(%arg0: i32, %arg1: i32, %arg2: memref<1x8x32xf32, #tpu.memory_space<vmem>>, %arg3: memref<1x32x96xbf16, #tpu.memory_space<vmem>>, %arg4: memref<1x1x96xf32, #tpu.memory_space<vmem>>, %arg5: memref<1x32x32xbf16, #tpu.memory_space<vmem>>, %arg6: memref<1x1x32xf32, #tpu.memory_space<vmem>>, %arg7: memref<1x1x32xf32, #tpu.memory_space<vmem>>, %arg8: memref<1x1x32xf32, #tpu.memory_space<vmem>>, %arg9: memref<1x1x32xf32, #tpu.memory_space<vmem>>, %arg10: memref<1x1x32xf32, #tpu.memory_space<vmem>>, %arg11: memref<1x32x64xbf16, #tpu.memory_space<vmem>>, %arg12: memref<1x1x64xf32, #tpu.memory_space<vmem>>, %arg13: memref<1x64x32xbf16, #tpu.memory_space<vmem>>, %arg14: memref<1x1x32xf32, #tpu.memory_space<vmem>>, %arg15: memref<1x8x32xf32, #tpu.memory_space<vmem>>, %arg16: memref<8x32xf32, #tpu.memory_space<vmem>>) attributes {dimension_semantics = [#tpu.dimension_semantics<parallel>, #tpu.dimension_semantics<arbitrary>], iteration_bounds = array<i64: 2, 2>, scalar_prefetch = 0 : i64, scratch_operands = 1 : i64, tpu.core_type = #tpu.core_type<tc>, window_params = [{transform_indices = @transform_0, window_bounds = array<i64: 1, 8, 32>}, {transform_indices = @transform_1, window_bounds = array<i64: 1, 32, 96>}, {transform_indices = @transform_2, window_bounds = array<i64: 1, 1, 96>}, {transform_indices = @transform_3, window_bounds = array<i64: 1, 32, 32>}, {transform_indices = @transform_4, window_bounds = array<i64: 1, 1, 32>}, {transform_indices = @transform_5, window_bounds = array<i64: 1, 1, 32>}, {transform_indices = @transform_6, window_bounds = array<i64: 1, 1, 32>}, {transform_indices = @transform_7, window_bounds = array<i64: 1, 1, 32>}, {transform_indices = @transform_8, window_bounds = array<i64: 1, 1, 32>}, {transform_indices = @transform_9, window_bounds = array<i64: 1, 32, 64>}, {transform_indices = @transform_10, window_bounds = array<i64: 1, 1, 64>}, {transform_indices = @transform_11, window_bounds = array<i64: 1, 64, 32>}, {transform_indices = @transform_12, window_bounds = array<i64: 1, 1, 32>}, {transform_indices = @transform_13, window_bounds = array<i64: 1, 8, 32>}]} {
    %c0_i32 = arith.constant 0 : i32
    %0 = arith.cmpi eq, %arg1, %c0_i32 : i32
    %1 = arith.extui %0 : i1 to i32
    %c0_i32_0 = arith.constant 0 : i32
    %2 = arith.cmpi ne, %1, %c0_i32_0 : i32
    scf.if %2 {
      %c0_59 = arith.constant 0 : index
      %c0_60 = arith.constant 0 : index
      %c0_61 = arith.constant 0 : index
      %127 = vector.load %arg2[%c0_59, %c0_60, %c0_61] : memref<1x8x32xf32, #tpu.memory_space<vmem>>, vector<1x8x32xf32>
      %128 = vector.shape_cast %127 : vector<1x8x32xf32> to vector<8x32xf32>
      %c0_62 = arith.constant 0 : index
      %c0_63 = arith.constant 0 : index
      %129 = vector.load %arg16[%c0_62, %c0_63] : memref<8x32xf32, #tpu.memory_space<vmem>>, vector<8x32xf32>
      tpu.vector_store %arg16[%c0_62, %c0_63], %128 {strides = array<i32>} : memref<8x32xf32, #tpu.memory_space<vmem>>, vector<8x32xf32>,
    } else {
    }
    %c0 = arith.constant 0 : index
    %c0_1 = arith.constant 0 : index
    %3 = vector.load %arg16[%c0, %c0_1] : memref<8x32xf32, #tpu.memory_space<vmem>>, vector<8x32xf32>
    %4 = arith.truncf %3 : vector<8x32xf32> to vector<8x32xbf16>
    %c0_2 = arith.constant 0 : index
    %c0_3 = arith.constant 0 : index
    %c0_4 = arith.constant 0 : index
    %5 = vector.load %arg3[%c0_2, %c0_3, %c0_4] : memref<1x32x96xbf16, #tpu.memory_space<vmem>>, vector<1x32x96xbf16>
    %6 = vector.shape_cast %5 : vector<1x32x96xbf16> to vector<32x96xbf16>
    %cst = arith.constant dense<0.000000e+00> : vector<8x96xf32>
    %7 = tpu.matmul %4, %6, %cst {dimension_numbers = #tpu.dot_dimension_numbers<[1], [0], [0], [1], [0, 0, 1, 1], [], []>} : vector<8x32xbf16>, vector<32x96xbf16>, vector<8x96xf32> -> vector<8x96xf32>
    %c0_5 = arith.constant 0 : index
    %c0_6 = arith.constant 0 : index
    %c0_7 = arith.constant 0 : index
    %8 = vector.load %arg4[%c0_5, %c0_6, %c0_7] : memref<1x1x96xf32, #tpu.memory_space<vmem>>, vector<1x1x96xf32>
    %9 = vector.shape_cast %8 : vector<1x1x96xf32> to vector<1x96xf32>
    %10 = vector.broadcast %9 : vector<1x96xf32> to vector<8x96xf32>
    %11 = arith.addf %7, %10 : vector<8x96xf32>
    %12 = vector.extract_strided_slice %11 {offsets = [0, 0], sizes = [8, 32], strides = [1, 1]} : vector<8x96xf32> to vector<8x32xf32>
    %13 = vector.shape_cast %12 : vector<8x32xf32> to vector<1x8x4x8xf32>
    %14 = tpu.transpose %13, [0, 2, 1, 3] : vector<1x8x4x8xf32> -> vector<1x4x8x8xf32>
    %15 = vector.shape_cast %14 : vector<1x4x8x8xf32> to vector<4x8x8xf32>
    %16 = arith.truncf %15 : vector<4x8x8xf32> to vector<4x8x8xbf16>
    %17 = vector.extract_strided_slice %11 {offsets = [0, 32], sizes = [8, 32], strides = [1, 1]} : vector<8x96xf32> to vector<8x32xf32>
    %18 = vector.shape_cast %17 : vector<8x32xf32> to vector<1x8x4x8xf32>
    %19 = tpu.transpose %18, [0, 2, 1, 3] : vector<1x8x4x8xf32> -> vector<1x4x8x8xf32>
    %20 = vector.shape_cast %19 : vector<1x4x8x8xf32> to vector<4x8x8xf32>
    %21 = arith.truncf %20 : vector<4x8x8xf32> to vector<4x8x8xbf16>
    %22 = vector.extract_strided_slice %11 {offsets = [0, 64], sizes = [8, 32], strides = [1, 1]} : vector<8x96xf32> to vector<8x32xf32>
    %23 = vector.shape_cast %22 : vector<8x32xf32> to vector<1x8x4x8xf32>
    %24 = tpu.transpose %23, [0, 2, 1, 3] : vector<1x8x4x8xf32> -> vector<1x4x8x8xf32>
    %25 = vector.shape_cast %24 : vector<1x4x8x8xf32> to vector<4x8x8xf32>
    %26 = arith.truncf %25 : vector<4x8x8xf32> to vector<4x8x8xbf16>
    "tpu.trace_start"() <{level = 10 : i32, message = "bqd,bkd->bqk"}> : () -> ()
    %cst_8 = arith.constant dense<0.000000e+00> : vector<4x8x8xf32>
    %27 = tpu.matmul %16, %21, %cst_8 {dimension_numbers = #tpu.dot_dimension_numbers<[2], [2], [1], [1], [0, 0, 0, 1, 1, 1], [0], [0]>} : vector<4x8x8xbf16>, vector<4x8x8xbf16>, vector<4x8x8xf32> -> vector<4x8x8xf32>
    "tpu.trace_stop"() : () -> ()
    %cst_9 = arith.constant dense<0xFF800000> : vector<4x8xf32>
    %28 = vector.multi_reduction <maximumf>, %27, %cst_9 [2] : vector<4x8x8xf32> to vector<4x8xf32>
    %29 = vector.shape_cast %28 : vector<4x8xf32> to vector<4x8x1xf32>
    %30 = vector.broadcast %29 : vector<4x8x1xf32> to vector<4x8x8xf32>
    %31 = arith.subf %27, %30 : vector<4x8x8xf32>
    %32 = math.exp %31 : vector<4x8x8xf32>
    %cst_10 = arith.constant dense<0.000000e+00> : vector<4x8xf32>
    %33 = vector.multi_reduction <add>, %32, %cst_10 [2] : vector<4x8x8xf32> to vector<4x8xf32>
    %34 = vector.shape_cast %33 : vector<4x8xf32> to vector<4x8x1xf32>
    %35 = tpu.reciprocal %34 {approx = true} : vector<4x8x1xf32> -> vector<4x8x1xf32>
    %36 = vector.broadcast %35 : vector<4x8x1xf32> to vector<4x8x8xf32>
    %37 = arith.mulf %32, %36 : vector<4x8x8xf32>
    %38 = arith.truncf %37 : vector<4x8x8xf32> to vector<4x8x8xbf16>
    "tpu.trace_start"() <{level = 10 : i32, message = "bqk,bkd->bqd"}> : () -> ()
    %cst_11 = arith.constant dense<0.000000e+00> : vector<4x8x8xf32>
    %39 = tpu.matmul %38, %26, %cst_11 {dimension_numbers = #tpu.dot_dimension_numbers<[2], [1], [1], [2], [0, 0, 0, 1, 1, 2], [0], [0]>} : vector<4x8x8xbf16>, vector<4x8x8xbf16>, vector<4x8x8xf32> -> vector<4x8x8xf32>
    "tpu.trace_stop"() : () -> ()
    %40 = vector.shape_cast %39 : vector<4x8x8xf32> to vector<1x4x8x8xf32>
    %41 = tpu.transpose %40, [0, 2, 1, 3] : vector<1x4x8x8xf32> -> vector<1x8x4x8xf32>
    %42 = vector.shape_cast %41 : vector<1x8x4x8xf32> to vector<8x32xf32>
    %43 = arith.truncf %42 : vector<8x32xf32> to vector<8x32xbf16>
    %c0_12 = arith.constant 0 : index
    %c0_13 = arith.constant 0 : index
    %c0_14 = arith.constant 0 : index
    %44 = vector.load %arg5[%c0_12, %c0_13, %c0_14] : memref<1x32x32xbf16, #tpu.memory_space<vmem>>, vector<1x32x32xbf16>
    %45 = vector.shape_cast %44 : vector<1x32x32xbf16> to vector<32x32xbf16>
    %cst_15 = arith.constant dense<0.000000e+00> : vector<8x32xf32>
    %46 = tpu.matmul %43, %45, %cst_15 {dimension_numbers = #tpu.dot_dimension_numbers<[1], [0], [0], [1], [0, 0, 1, 1], [], []>} : vector<8x32xbf16>, vector<32x32xbf16>, vector<8x32xf32> -> vector<8x32xf32>
    %c0_16 = arith.constant 0 : index
    %c0_17 = arith.constant 0 : index
    %c0_18 = arith.constant 0 : index
    %47 = vector.load %arg6[%c0_16, %c0_17, %c0_18] : memref<1x1x32xf32, #tpu.memory_space<vmem>>, vector<1x1x32xf32>
    %48 = vector.shape_cast %47 : vector<1x1x32xf32> to vector<1x32xf32>
    %49 = vector.broadcast %48 : vector<1x32xf32> to vector<8x32xf32>
    %50 = arith.addf %46, %49 : vector<8x32xf32>
    %51 = arith.addf %3, %50 : vector<8x32xf32>
    %c0_19 = arith.constant 0 : index
    %c0_20 = arith.constant 0 : index
    %c0_21 = arith.constant 0 : index
    %52 = vector.load %arg7[%c0_19, %c0_20, %c0_21] : memref<1x1x32xf32, #tpu.memory_space<vmem>>, vector<1x1x32xf32>
    %53 = vector.shape_cast %52 : vector<1x1x32xf32> to vector<1x32xf32>
    %c0_22 = arith.constant 0 : index
    %c0_23 = arith.constant 0 : index
    %c0_24 = arith.constant 0 : index
    %54 = vector.load %arg8[%c0_22, %c0_23, %c0_24] : memref<1x1x32xf32, #tpu.memory_space<vmem>>, vector<1x1x32xf32>
    %55 = vector.shape_cast %54 : vector<1x1x32xf32> to vector<1x32xf32>
    %cst_25 = arith.constant dense<0.000000e+00> : vector<8xf32>
    %56 = vector.multi_reduction <add>, %51, %cst_25 [1] : vector<8x32xf32> to vector<8xf32>
    %57 = vector.shape_cast %56 : vector<8xf32> to vector<8x1xf32>
    %cst_26 = arith.constant 3.200000e+01 : f32
    %58 = vector.broadcast %cst_26 : f32 to vector<8x1xf32>
    %59 = arith.divf %57, %58 : vector<8x1xf32>
    %60 = vector.broadcast %59 : vector<8x1xf32> to vector<8x32xf32>
    %61 = arith.subf %51, %60 : vector<8x32xf32>
    %62 = arith.mulf %61, %61 : vector<8x32xf32>
    %cst_27 = arith.constant dense<0.000000e+00> : vector<8xf32>
    %63 = vector.multi_reduction <add>, %62, %cst_27 [1] : vector<8x32xf32> to vector<8xf32>
    %64 = vector.shape_cast %63 : vector<8xf32> to vector<8x1xf32>
    %cst_28 = arith.constant 3.200000e+01 : f32
    %65 = vector.broadcast %cst_28 : f32 to vector<8x1xf32>
    %66 = arith.divf %64, %65 : vector<8x1xf32>
    %67 = vector.broadcast %59 : vector<8x1xf32> to vector<8x32xf32>
    %68 = arith.subf %51, %67 : vector<8x32xf32>
    %cst_29 = arith.constant 9.99999974E-6 : f32
    %69 = vector.broadcast %cst_29 : f32 to vector<8x1xf32>
    %70 = arith.addf %66, %69 : vector<8x1xf32>
    %71 = math.rsqrt %70 : vector<8x1xf32>
    %72 = vector.broadcast %71 : vector<8x1xf32> to vector<8x32xf32>
    %73 = arith.mulf %68, %72 : vector<8x32xf32>
    %74 = vector.broadcast %53 : vector<1x32xf32> to vector<8x32xf32>
    %75 = arith.mulf %73, %74 : vector<8x32xf32>
    %76 = vector.broadcast %55 : vector<1x32xf32> to vector<8x32xf32>
    %77 = arith.addf %75, %76 : vector<8x32xf32>
    %78 = arith.truncf %77 : vector<8x32xf32> to vector<8x32xbf16>
    %c0_30 = arith.constant 0 : index
    %c0_31 = arith.constant 0 : index
    %c0_32 = arith.constant 0 : index
    %79 = vector.load %arg11[%c0_30, %c0_31, %c0_32] : memref<1x32x64xbf16, #tpu.memory_space<vmem>>, vector<1x32x64xbf16>
    %80 = vector.shape_cast %79 : vector<1x32x64xbf16> to vector<32x64xbf16>
    %cst_33 = arith.constant dense<0.000000e+00> : vector<8x64xf32>
    %81 = tpu.matmul %78, %80, %cst_33 {dimension_numbers = #tpu.dot_dimension_numbers<[1], [0], [0], [1], [0, 0, 1, 1], [], []>} : vector<8x32xbf16>, vector<32x64xbf16>, vector<8x64xf32> -> vector<8x64xf32>
    %c0_34 = arith.constant 0 : index
    %c0_35 = arith.constant 0 : index
    %c0_36 = arith.constant 0 : index
    %82 = vector.load %arg12[%c0_34, %c0_35, %c0_36] : memref<1x1x64xf32, #tpu.memory_space<vmem>>, vector<1x1x64xf32>
    %83 = vector.shape_cast %82 : vector<1x1x64xf32> to vector<1x64xf32>
    %84 = vector.broadcast %83 : vector<1x64xf32> to vector<8x64xf32>
    %85 = arith.addf %81, %84 : vector<8x64xf32>
    %cst_37 = arith.constant 0.000000e+00 : f32
    %86 = vector.broadcast %cst_37 : f32 to vector<8x64xf32>
    %87 = arith.maximumf %85, %86 : vector<8x64xf32>
    %88 = arith.truncf %87 : vector<8x64xf32> to vector<8x64xbf16>
    %c0_38 = arith.constant 0 : index
    %c0_39 = arith.constant 0 : index
    %c0_40 = arith.constant 0 : index
    %89 = vector.load %arg13[%c0_38, %c0_39, %c0_40] : memref<1x64x32xbf16, #tpu.memory_space<vmem>>, vector<1x64x32xbf16>
    %90 = vector.shape_cast %89 : vector<1x64x32xbf16> to vector<64x32xbf16>
    %cst_41 = arith.constant dense<0.000000e+00> : vector<8x32xf32>
    %91 = tpu.matmul %88, %90, %cst_41 {dimension_numbers = #tpu.dot_dimension_numbers<[1], [0], [0], [1], [0, 0, 1, 1], [], []>} : vector<8x64xbf16>, vector<64x32xbf16>, vector<8x32xf32> -> vector<8x32xf32>
    %c0_42 = arith.constant 0 : index
    %c0_43 = arith.constant 0 : index
    %c0_44 = arith.constant 0 : index
    %92 = vector.load %arg14[%c0_42, %c0_43, %c0_44] : memref<1x1x32xf32, #tpu.memory_space<vmem>>, vector<1x1x32xf32>
    %93 = vector.shape_cast %92 : vector<1x1x32xf32> to vector<1x32xf32>
    %94 = vector.broadcast %93 : vector<1x32xf32> to vector<8x32xf32>
    %95 = arith.addf %91, %94 : vector<8x32xf32>
    %96 = arith.addf %77, %95 : vector<8x32xf32>
    %c0_45 = arith.constant 0 : index
    %c0_46 = arith.constant 0 : index
    %c0_47 = arith.constant 0 : index
    %97 = vector.load %arg9[%c0_45, %c0_46, %c0_47] : memref<1x1x32xf32, #tpu.memory_space<vmem>>, vector<1x1x32xf32>
    %98 = vector.shape_cast %97 : vector<1x1x32xf32> to vector<1x32xf32>
    %c0_48 = arith.constant 0 : index
    %c0_49 = arith.constant 0 : index
    %c0_50 = arith.constant 0 : index
    %99 = vector.load %arg10[%c0_48, %c0_49, %c0_50] : memref<1x1x32xf32, #tpu.memory_space<vmem>>, vector<1x1x32xf32>
    %100 = vector.shape_cast %99 : vector<1x1x32xf32> to vector<1x32xf32>
    %cst_51 = arith.constant dense<0.000000e+00> : vector<8xf32>
    %101 = vector.multi_reduction <add>, %96, %cst_51 [1] : vector<8x32xf32> to vector<8xf32>
    %102 = vector.shape_cast %101 : vector<8xf32> to vector<8x1xf32>
    %cst_52 = arith.constant 3.200000e+01 : f32
    %103 = vector.broadcast %cst_52 : f32 to vector<8x1xf32>
    %104 = arith.divf %102, %103 : vector<8x1xf32>
    %105 = vector.broadcast %104 : vector<8x1xf32> to vector<8x32xf32>
    %106 = arith.subf %96, %105 : vector<8x32xf32>
    %107 = arith.mulf %106, %106 : vector<8x32xf32>
    %cst_53 = arith.constant dense<0.000000e+00> : vector<8xf32>
    %108 = vector.multi_reduction <add>, %107, %cst_53 [1] : vector<8x32xf32> to vector<8xf32>
    %109 = vector.shape_cast %108 : vector<8xf32> to vector<8x1xf32>
    %cst_54 = arith.constant 3.200000e+01 : f32
    %110 = vector.broadcast %cst_54 : f32 to vector<8x1xf32>
    %111 = arith.divf %109, %110 : vector<8x1xf32>
    %112 = vector.broadcast %104 : vector<8x1xf32> to vector<8x32xf32>
    %113 = arith.subf %96, %112 : vector<8x32xf32>
    %cst_55 = arith.constant 9.99999974E-6 : f32
    %114 = vector.broadcast %cst_55 : f32 to vector<8x1xf32>
    %115 = arith.addf %111, %114 : vector<8x1xf32>
    %116 = math.rsqrt %115 : vector<8x1xf32>
    %117 = vector.broadcast %116 : vector<8x1xf32> to vector<8x32xf32>
    %118 = arith.mulf %113, %117 : vector<8x32xf32>
    %119 = vector.broadcast %98 : vector<1x32xf32> to vector<8x32xf32>
    %120 = arith.mulf %118, %119 : vector<8x32xf32>
    %121 = vector.broadcast %100 : vector<1x32xf32> to vector<8x32xf32>
    %122 = arith.addf %120, %121 : vector<8x32xf32>
    %c0_56 = arith.constant 0 : index
    %c0_57 = arith.constant 0 : index
    %123 = vector.load %arg16[%c0_56, %c0_57] : memref<8x32xf32, #tpu.memory_space<vmem>>, vector<8x32xf32>
    tpu.vector_store %arg16[%c0_56, %c0_57], %122 {strides = array<i32>} : memref<8x32xf32, #tpu.memory_space<vmem>>, vector<8x32xf32>,
    %c1_i32 = arith.constant 1 : i32
    %124 = arith.cmpi eq, %arg1, %c1_i32 : i32
    %125 = arith.extui %124 : i1 to i32
    %c0_i32_58 = arith.constant 0 : i32
    %126 = arith.cmpi ne, %125, %c0_i32_58 : i32
    scf.if %126 {
      %c0_59 = arith.constant 0 : index
      %c0_60 = arith.constant 0 : index
      %127 = vector.load %arg16[%c0_59, %c0_60] : memref<8x32xf32, #tpu.memory_space<vmem>>, vector<8x32xf32>
      %128 = vector.shape_cast %127 : vector<8x32xf32> to vector<1x8x32xf32>
      %c0_61 = arith.constant 0 : index
      %c0_62 = arith.constant 0 : index
      %c0_63 = arith.constant 0 : index
      %129 = vector.load %arg15[%c0_61, %c0_62, %c0_63] : memref<1x8x32xf32, #tpu.memory_space<vmem>>, vector<1x8x32xf32>
      tpu.vector_store %arg15[%c0_61, %c0_62, %c0_63], %128 {strides = array<i32>} : memref<1x8x32xf32, #tpu.memory_space<vmem>>, vector<1x8x32xf32>,
    } else {
    }
    return
  }
  func.func @transform_0(%arg0: i32, %arg1: i32) -> (i32, i32, i32) {
    %c0_i32 = arith.constant 0 : i32
    %c0_i32_0 = arith.constant 0 : i32
    %c0_i32_1 = arith.constant 0 : i32
    return %arg0, %c0_i32, %c0_i32_0 : i32, i32, i32
  }
  func.func @transform_1(%arg0: i32, %arg1: i32) -> (i32, i32, i32) {
    %c0_i32 = arith.constant 0 : i32
    %c0_i32_0 = arith.constant 0 : i32
    %c0_i32_1 = arith.constant 0 : i32
    return %arg1, %c0_i32, %c0_i32_0 : i32, i32, i32
  }
  func.func @transform_2(%arg0: i32, %arg1: i32) -> (i32, i32, i32) {
    %c0_i32 = arith.constant 0 : i32
    %c0_i32_0 = arith.constant 0 : i32
    %c0_i32_1 = arith.constant 0 : i32
    return %arg1, %c0_i32, %c0_i32_0 : i32, i32, i32
  }
  func.func @transform_3(%arg0: i32, %arg1: i32) -> (i32, i32, i32) {
    %c0_i32 = arith.constant 0 : i32
    %c0_i32_0 = arith.constant 0 : i32
    %c0_i32_1 = arith.constant 0 : i32
    return %arg1, %c0_i32, %c0_i32_0 : i32, i32, i32
  }
  func.func @transform_4(%arg0: i32, %arg1: i32) -> (i32, i32, i32) {
    %c0_i32 = arith.constant 0 : i32
    %c0_i32_0 = arith.constant 0 : i32
    %c0_i32_1 = arith.constant 0 : i32
    return %arg1, %c0_i32, %c0_i32_0 : i32, i32, i32
  }
  func.func @transform_5(%arg0: i32, %arg1: i32) -> (i32, i32, i32) {
    %c0_i32 = arith.constant 0 : i32
    %c0_i32_0 = arith.constant 0 : i32
    %c0_i32_1 = arith.constant 0 : i32
    return %arg1, %c0_i32, %c0_i32_0 : i32, i32, i32
  }
  func.func @transform_6(%arg0: i32, %arg1: i32) -> (i32, i32, i32) {
    %c0_i32 = arith.constant 0 : i32
    %c0_i32_0 = arith.constant 0 : i32
    %c0_i32_1 = arith.constant 0 : i32
    return %arg1, %c0_i32, %c0_i32_0 : i32, i32, i32
  }
  func.func @transform_7(%arg0: i32, %arg1: i32) -> (i32, i32, i32) {
    %c0_i32 = arith.constant 0 : i32
    %c0_i32_0 = arith.constant 0 : i32
    %c0_i32_1 = arith.constant 0 : i32
    return %arg1, %c0_i32, %c0_i32_0 : i32, i32, i32
  }
  func.func @transform_8(%arg0: i32, %arg1: i32) -> (i32, i32, i32) {
    %c0_i32 = arith.constant 0 : i32
    %c0_i32_0 = arith.constant 0 : i32
    %c0_i32_1 = arith.constant 0 : i32
    return %arg1, %c0_i32, %c0_i32_0 : i32, i32, i32
  }
  func.func @transform_9(%arg0: i32, %arg1: i32) -> (i32, i32, i32) {
    %c0_i32 = arith.constant 0 : i32
    %c0_i32_0 = arith.constant 0 : i32
    %c0_i32_1 = arith.constant 0 : i32
    return %arg1, %c0_i32, %c0_i32_0 : i32, i32, i32
  }
  func.func @transform_10(%arg0: i32, %arg1: i32) -> (i32, i32, i32) {
    %c0_i32 = arith.constant 0 : i32
    %c0_i32_0 = arith.constant 0 : i32
    %c0_i32_1 = arith.constant 0 : i32
    return %arg1, %c0_i32, %c0_i32_0 : i32, i32, i32
  }
  func.func @transform_11(%arg0: i32, %arg1: i32) -> (i32, i32, i32) {
    %c0_i32 = arith.constant 0 : i32
    %c0_i32_0 = arith.constant 0 : i32
    %c0_i32_1 = arith.constant 0 : i32
    return %arg1, %c0_i32, %c0_i32_0 : i32, i32, i32
  }
  func.func @transform_12(%arg0: i32, %arg1: i32) -> (i32, i32, i32) {
    %c0_i32 = arith.constant 0 : i32
    %c0_i32_0 = arith.constant 0 : i32
    %c0_i32_1 = arith.constant 0 : i32
    return %arg1, %c0_i32, %c0_i32_0 : i32, i32, i32
  }
  func.func @transform_13(%arg0: i32, %arg1: i32) -> (i32, i32, i32) {
    %c0_i32 = arith.constant 0 : i32
    %c0_i32_0 = arith.constant 0 : i32
    %c0_i32_1 = arith.constant 0 : i32
    return %arg0, %c0_i32, %c0_i32_0 : i32, i32, i32
  }
}

</mosaic_0001>

<bundles_post_ra>
// kernel: transformer_encoder.1
= control target key start
LH: loop header
LB: loop body
LE: loop exit
PB: predicated region body
PF: predicated region fallthrough
CT: control target
= control target key end

     0   :  { %s3244_s0 = inlined_call_operand.hbm [shape: f32[2,8,32], index: 0, kind: input, shape index: {}]   ;;  %s3245_s1 = inlined_call_operand.vmem [shape: bf16[2,32,96], index: 1, kind: input, shape index: {}]   ;;  %s3246_s2 = inlined_call_operand.vmem [shape: f32[2,1,96], index: 2, kind: input, shape index: {}]   ;;  %s3247_s3 = inlined_call_operand.vmem [shape: bf16[2,32,32], index: 3, kind: input, shape index: {}]   ;;  %s3248_s4 = inlined_call_operand.hbm [shape: f32[2,1,32], index: 4, kind: input, shape index: {}]   ;;  %s3249_s5 = inlined_call_operand.vmem [shape: f32[2,1,32], index: 5, kind: input, shape index: {}]   ;;  %s3250_s6 = inlined_call_operand.hbm [shape: f32[2,1,32], index: 6, kind: input, shape index: {}]   ;;  %s3251_s7 = inlined_call_operand.vmem [shape: f32[2,1,32], index: 7, kind: input, shape index: {}]   ;;  %s3252_s8 = inlined_call_operand.hbm [shape: f32[2,1,32], index: 8, kind: input, shape index: {}]   ;;  %s3253_s9 = inlined_call_operand.vmem [shape: bf16[2,32,64], index: 9, kind: input, shape index: {}]   ;;  %s3254_s10 = inlined_call_operand.hbm [shape: f32[2,1,64], index: 10, kind: input, shape index: {}]   ;;  %s3255_s11 = inlined_call_operand.vmem [shape: bf16[2,64,32], index: 11, kind: input, shape index: {}]   ;;  %s3256_s12 = inlined_call_operand.hbm [shape: f32[2,1,32], index: 12, kind: input, shape index: {}]   ;;  %s3257_s13 = inlined_call_operand.hbm [shape: f32[2,8,32], index: 13, kind: output, shape index: {}]  }
   0x1   :  { %3273 = sst [smem:[#allocation34_spill]] %s3244_s0 }
   0x2   :  { %3274 = sst [smem:[#allocation35_spill]] %s3245_s1 }
   0x3   :  { %3275 = sst [smem:[#allocation36_spill]] %s3246_s2 }
   0x4   :  { %3276 = sst [smem:[#allocation37_spill]] %s3247_s3 }
   0x5   :  { %3277 = sst [smem:[#allocation38_spill]] %s3248_s4 }
   0x6   :  { %3278 = sst [smem:[#allocation39_spill]] %s3249_s5 }
   0x7   :  { %3279 = sst [smem:[#allocation40_spill]] %s3250_s6 }
   0x8   :  { %3280 = sst [smem:[#allocation41_spill]] %s3251_s7 }
   0x9   :  { %3281 = sst [smem:[#allocation42_spill]] %s3252_s8 }
   0xa   :  { %3282 = sst [smem:[#allocation43_spill]] %s3253_s9 }
   0xb   :  { %3283 = sst [smem:[#allocation44_spill]] %s3254_s10 }
   0xc   :  { %3284 = sst [smem:[#allocation45_spill]] %s3255_s11 }
   0xd   :  { %3285 = sst [smem:[#allocation46_spill]] %s3256_s12 }
   0xe   :  { %3286 = sst [smem:[#allocation47_spill]] %s3257_s13 }
   0xf   :  { %18 = vsyncpa [#allocation4], 0 }
  0x10   :  { %20 = vsyncpa [#allocation4 + $0x1], 0 }
  0x11   :  { %21 = vsyncpa [#allocation7], 0 }
  0x12   :  { %23 = vsyncpa [#allocation7 + $0x1], 0 }
  0x13   :  { %24 = vsyncpa [#allocation10], 0 }
  0x14   :  { %26 = vsyncpa [#allocation10 + $0x1], 0 }
  0x15   :  { %27 = vsyncpa [#allocation13], 0 }
  0x16   :  { %29 = vsyncpa [#allocation13 + $0x1], 0 }
  0x17   :  { %30 = vsyncpa [#allocation5], 0 }
  0x18   :  { %32 = vsyncpa [#allocation5 + $0x1], 0  ;;  %s2658_s25 = smov 0   ;;  %s2660_s26 = smov 0  }
  0x19   :  { %s2662_s27 = smov 0   ;;  %s2664_s28 = smov 0  }
  0x1a   :  { %s2666_s29 = smov 0   ;;  %s2668_s30 = smov 0  }
  0x1b   :  { %s2670_s14 = smov 0   ;;  %s2672_s15 = smov 0  }
  0x1c   :  { %s2674_s16 = smov 0   ;;  %s2676_s17 = smov 0  }
  0x1d   :  { %s2678_s18 = smov 0  }
  0x1e LB: > { %3287 = sst [smem:[#allocation20_spill]] %s2539_s26  ;;  %p65_p0 = scmp.eq.s32.totalorder %s2575_s18, 0  ;;  %s2575_s18 = sphi %s2678_s18, %s38_s18   ;;  %s2571_s17 = sphi %s2676_s17, %s3347_s17   ;;  %s2567_s16 = sphi %s2674_s16, %s3346_s16   ;;  %s2563_s15 = sphi %s2672_s15, %s3345_s15   ;;  %s2559_s14 = sphi %s2670_s14, %s3344_s14   ;;  %s2555_s30 = sphi %s2668_s30, %s3343_s30   ;;  %s2551_s29 = sphi %s2666_s29, %s3342_s29   ;;  %s2547_s28 = sphi %s2664_s28, %s3341_s28   ;;  %s2543_s27 = sphi %s2662_s27, %s3340_s27   ;;  %s2539_s26 = sphi %s2660_s26, %s3339_s26   ;;  %s2535_s25 = sphi %s2658_s25, %s3338_s25  }
  0x1f   : > { %3288 = sst [smem:[#allocation21_spill]] %s2543_s27  ;;  %p168_p1 = scmp.ne.s32.totalorder %s2543_s27, %s2539_s26 }
  0x20   : > { %3289 = sst [smem:[#allocation22_spill]] %s2551_s29  ;;  %p3260_p2 = scmp.lt.s32.totalorder %s2575_s18, 4 }
  0x21   : > { %3290 = sst [smem:[#allocation23_spill]] %s2555_s30  ;;  %s473_s20 = sand.u32 1, %s2575_s18  }
  0x22   : > { %3291 = sst [smem:[#allocation24_spill]] %s2559_s14  ;;  %p170_p3 = por %p168_p1, %p65_p0 }
  0x23   : > { %3292 = sst [smem:[#allocation25_spill]] %s2563_s15  ;;  %s2722_s21 = sand.u32 1, %s2543_s27  }
  0x24   : > { %3293 = sst [smem:[#allocation26_spill]] %s2567_s16  ;;  %s476_s15 = scalar_lea.vmem [#allocation6], %s2722_s21 }
  0x25   : > { %3294 = sst [smem:[#allocation27_spill]] %s2571_s17  ;;  %s483_s11 = sshll.u32 %s476_s15, 4  ;;  %s484_s11 = int_to_ptr.vmem [resolvable:$true] %s483_s11 }
  0x26   : > { %s3295_s4 = sld [smem:[#allocation38_spill]]  ;;  %p2731_p4 = pnand %p3260_p2, %p170_p3 }
  0x27   : > { %p1990_p5 = scmp.ge.s32.totalorder %s2575_s18, 1  ;;  %p584_p6 = scmp.lt.s32.totalorder %s2575_s18, 5 }
  0x28   : > { %s2737_s22 = scalar_lea.sflag [#allocation7], %s473_s20  ;;  %s3298_s8 = sld [smem:[#allocation42_spill]] }
  0x29   : > { %p2742_p7 = pnand %p1990_p5, %p584_p6  ;;  %s522_s9 = scalar_lea.vmem [#allocation9], %s2722_s21 }
  0x2a   : > { %s529_s7 = sshll.u32 %s522_s9, 4  ;;  %s1985_s23 = sadd.s32 4294967294, %s2575_s18   ;;  %s530_s7 = int_to_ptr.vmem [resolvable:$true] %s529_s7 }
  0x2b   : > { %s47_s9 = sadd.s32 1, %s2567_s16  ;;  %p64_p9 = scmp.ne.s32.totalorder %s2555_s30, %s2551_s29 }
  0x2c   : > { %s479_s24 = scalar_lea.hbm %s3295_s4, %s2567_s16  ;;  %p48_p8 = scmp.ge.s32.totalorder %s47_s9, 2 }
  0x2d   : > { %s481_s13 = sshll.u32 %s479_s24, 4  ;;  %s57_s24 = sadd.s32 1, %s2555_s30  ;;  %s482_s13 = int_to_ptr.hbm [resolvable:$true] %s481_s13 }
  0x2e   : > { %2093 = dma.hbm_to_vmem [thread:$0]  (!%p2731_p4), %s482_s13, 16, %s484_s11, %s2737_s22  }
  0x2f   : > { %s525_s4 = scalar_lea.hbm %s3298_s8, %s2567_s16  ;;  %s2751_s11 = scalar_lea.sflag [#allocation10], %s473_s20 }
  0x30   : > { %s527_s5 = sshll.u32 %s525_s4, 4  ;;  %s2757_s13 = sadd.s32 4294967295, %s2575_s18   ;;  %s528_s5 = int_to_ptr.hbm [resolvable:$true] %s527_s5 }
  0x31   : > { %2099 = dma.hbm_to_vmem [thread:$0]  (!%p2731_p4), %s528_s5, 16, %s530_s7, %s2751_s11  }
  0x32   : > { %s50_s4 = sadd.s32 1, %s2571_s17  ;;  %s3349_s9 = smov (%p48_p8, %s47_s9), 0 }
  0x33   : > { %3299 = sst [smem:[#allocation28_spill]] %s3349_s9  ;;  %s3351_s4 = smov (!%p48_p8, %s50_s4), %s2571_s17 }
  0x34   : > { %p2773_p10 = por %p65_p0, %p64_p9  ;;  %p70_p11 = scmp.ne.s32.totalorder %s2551_s29, %s2547_s28 }
  0x35   : > { %p52_p12 = scmp.ge.s32.totalorder %s3351_s4, 2  ;;  %p71_p13 = scmp.eq.s32.totalorder %s2757_s13, 0 }
  0x36   : > { %s158_s7 = ssub.s32 %s2567_s16, %s3349_s9  ;;  %p174_p1 = scmp.ne.s32.totalorder %s2539_s26, %s2535_s25 }
  0x37   : > { %s3353_s4 = smov (%p52_p12, %s3351_s4), 0  ;;  %p2789_p3 = por %p71_p13, %p70_p11 }
  0x38   : > { %3301 = sst [smem:[#allocation29_spill]] %s3353_s4  ;;  %p159_p0 = scmp.eq.s32.totalorder %s158_s7, 0 }
  0x39   : > { %s54_s8 = ssub.s32 %s2571_s17, %s3353_s4  ;;  %p2795_p5 = por %p174_p1, %p71_p13 }
  0x3a   : > { %p55_p6 = scmp.eq.s32.totalorder %s54_s8, 0  ;;  %p406_p8 = scmp.eq.s32.totalorder %s2757_s13, 3 }
  0x3b   : > { %s3303_s3 = scalar_select %p2795_p5, 1, 0 }
  0x3c   : > { %s3305_s9 = sadd.s32 1, %s2543_s27  ;;  %p2811_p12 = por %p406_p8, %p64_p9 }
  0x3d   : > { %3304 = sst [smem:[#allocation30_spill]] %s3303_s3  ;;  %p412_p2 = scmp.eq.s32.totalorder %s1985_s23, 3 }
  0x3e   : > { %s2803_s25 = scalar_select %p159_p0, %s2543_s27, %s3305_s9  }
  0x3f   : > { %s2806_s1 = scalar_select %p55_p6, %s2555_s30, %s57_s24  }
  0x40   : > { %3306 = sst [smem:[#allocation31_spill]] %s2803_s25  ;;  %s432_s7 = sand.u32 1, %s2555_s30  }
  0x41   : > { %3307 = sst [smem:[#allocation32_spill]] %s2806_s1  ;;  %s1989_s4 = sshll.u32 %s2571_s17, 3 }
  0x42   : > { %p2820_p13 = por %p412_p2, %p70_p11  ;;  %s1988_s14 = sshll.u32 %s432_s7, 3 }
  0x43   : > { %s3311_s0 = sld [smem:[#allocation34_spill]]  ;;  %s436_s23 = scalar_lea.vmem [#allocation3], %s1988_s14 }
  0x44   : > { %s3309_s8 = scalar_select %p2820_p13, 1, 0 }
  0x45   : > { %s444_s30 = sshll.u32 %s436_s23, 4  ;;  %p3312_p9 = scmp.lt.s32.totalorder %s2575_s18, 4  ;;  %s445_s30 = int_to_ptr.vmem [resolvable:$true] %s444_s30 }
  0x46   : > { %3310 = sst [smem:[#allocation33_spill]] %s3309_s8  ;;  %s433_s9 = scalar_lea.sflag [#allocation4], %s432_s7 }
  0x47   : > { %p2088_p2 = pnand %p3312_p9, %p2773_p10  ;;  %s3313_s6 = sld [smem:[#allocation40_spill]] }
  0x48   : > { %s3314_s10 = sld [smem:[#allocation44_spill]]  ;;  %s547_s25 = scalar_lea.vmem [#allocation11], %s2722_s21 }
  0x49   : > { %s440_s24 = scalar_lea.hbm %s3311_s0, %s1989_s4  ;;  %s499_s4 = scalar_lea.vmem [#allocation8], %s2722_s21 }
  0x4a   : > { %s442_s1 = sshll.u32 %s440_s24, 4  ;;  %s506_s24 = sshll.u32 %s499_s4, 4  ;;  %s443_s1 = int_to_ptr.hbm [resolvable:$true] %s442_s1  ;;  %s507_s24 = int_to_ptr.vmem [resolvable:$true] %s506_s24 }
  0x4b   : > { %2090 = dma.hbm_to_vmem [thread:$0]  (!%p2088_p2), %s443_s1, 128, %s445_s30, %s433_s9  }
  0x4c   : > { %s554_s23 = sshll.u32 %s547_s25, 4  ;;  %s3315_s12 = sld [smem:[#allocation46_spill]]  ;;  %s555_s23 = int_to_ptr.vmem [resolvable:$true] %s554_s23 }
  0x4d   : > { %s502_s27 = scalar_lea.hbm %s3313_s6, %s2567_s16  ;;  %s572_s9 = scalar_lea.vmem [#allocation12], %s2722_s21 }
  0x4e   : > { %s504_s3 = sshll.u32 %s502_s27, 4  ;;  %s550_s17 = scalar_lea.hbm %s3314_s10, %s2567_s16  ;;  %s505_s3 = int_to_ptr.hbm [resolvable:$true] %s504_s3 }
  0x4f   : > { %2096 = dma.hbm_to_vmem [thread:$0]  (!%p2731_p4), %s505_s3, 16, %s507_s24, %s2737_s22  }
  0x50   : > { %s552_s0 = sshll.u32 %s550_s17, 4  ;;  %s579_s4 = sshll.u32 %s572_s9, 4  ;;  %s553_s0 = int_to_ptr.hbm [resolvable:$true] %s552_s0  ;;  %s580_s4 = int_to_ptr.vmem [resolvable:$true] %s579_s4 }
  0x51   : > { %2102 = dma.hbm_to_vmem [thread:$0]  (!%p2731_p4), %s553_s0, 16, %s555_s23, %s2751_s11  }
  0x52   : > { %s575_s30 = scalar_lea.hbm %s3315_s12, %s2567_s16  ;;  %s570_s22 = scalar_lea.sflag [#allocation13], %s2722_s21 }
  0x53   : > { %s577_s7 = sshll.u32 %s575_s30, 4  ;;  %588 = sbr.rel (%p2742_p7) target bundleno = 2168 (0x878), region = 72  ;;  %s578_s7 = int_to_ptr.hbm [resolvable:$true] %s577_s7 }
  0x54   : > { %2105 = dma.hbm_to_vmem [thread:$0]  (!%p2731_p4), %s578_s7, 16, %s580_s4, %s570_s22  }
  0x55   : > { %s2858_s3 = sand.u32 (!%p2742_p7), 1, %s2551_s29  }
  0x56   : > { %s3268_s0 = sshll.u32 (!%p2742_p7), %s2858_s3, 3  ;;  %s591_s11 = scalar_lea.sflag (!%p2742_p7), [#allocation4], %s2858_s3 }
  0x57   : > { %s2864_s24 = scalar_lea.vmem (!%p2742_p7), [#allocation3], %s3268_s0 }
  0x58   : > { %2514 = dma.done.wait (%p2789_p3), %s591_s11, 128  }
  0x59   : > { %2516 = vsyncadd (%p2789_p3), %s591_s11, 4294967168  ;;  %s600_s21 = sand.u32 1, %s2757_s13   ;;  %s2872_s15 = sand.u32 1, %s2539_s26  }
  0x5a   : > { %s601_s14 = scalar_lea.sflag [#allocation7], %s600_s21 }
  0x5b   : > { %2518 = dma.done.wait (%p2795_p5), %s601_s14, 32  }
  0x5c   : > { %2520 = vsyncadd (%p2795_p5), %s601_s14, 4294967264  ;;  %s619_s20 = scalar_lea.sflag [#allocation10], %s600_s21 }
  0x5d   : > { %2522 = dma.done.wait (%p2795_p5), %s619_s20, 32  }
  0x5e   : > { %2524 = vsyncadd (%p2795_p5), %s619_s20, 4294967264  ;;  %s637_s23 = scalar_lea.sflag [#allocation13], %s2872_s15 }
  0x5f   : > { %2526 = dma.done.wait (%p2795_p5), %s637_s23, 16  }
  0x60   : > { %2528 = vsyncadd (%p2795_p5), %s637_s23, 4294967280  ;;  %s3317_s27 = sld [smem:[#allocation24_spill]] }
  0x61   : > { %s3318_s22 = sld [smem:[#allocation36_spill]] }
  0x62   : > { %s3319_s19 = sld [smem:[#allocation35_spill]] }
  0x63   : > { %s3320_s1 = sld [smem:[#allocation37_spill]] }
  0x64   : > { %s3321_s0 = sld [smem:[#allocation39_spill]] }
  0x65   : > { %s3322_s16 = sld [smem:[#allocation41_spill]] }
  0x66   : > { %p732_p4 = scmp.lt.s32.totalorder %s3317_s27, 1  ;;  %s3323_s4 = sld [smem:[#allocation43_spill]] }
  0x67   : > { %s3324_s8 = sld [smem:[#allocation45_spill]]  ;;  %p2001_p7 = scmp.ne.s32.totalorder %s3317_s27, 0 }
  0x68   : > { %s2894_s30 = scalar_select %p732_p4, %s3317_s27, 1 }
  0x6a   : > { %s2059_s7 = sshll.u32 %s2894_s30, 4  ;;  %s739_s11 = scalar_lea.vmem %s3318_s22, %s2894_s30 }
  0x6b   : > { %s736_s20 = scalar_lea.vmem %s3319_s19, %s2059_s7  ;;  %s2907_s13 = scalar_lea.vmem %s3320_s1, %s2059_s7 }
  0x6c   : > { %s747_s6 = scalar_lea.vmem %s3321_s0, %s2894_s30  ;;  %s750_s29 = scalar_lea.vmem %s3322_s16, %s2894_s30 }
  0x6d   : > { %s2920_s22 = scalar_lea.vmem %s3323_s4, %s2059_s7  ;;  %s2062_s21 = sshll.u32 %s2894_s30, 5 }
  0x6e   : > { %s2926_s25 = scalar_lea.vmem %s3324_s8, %s2062_s21  ;;  %s3325_s1 = sshll.u32 %s2858_s3, 3 }
  0x6f   : > { %s2930_s23 = scalar_lea.vmem [#allocation14], %s3325_s1  ;;  %765 = sbr.rel (%p2001_p7) target bundleno = 118 (0x76), region = 100 }
  0x74   : > { %v766_v0 = vld [vmem:[%s2864_s24] sm:$0xff]  ;;  %vm767_vm0 = vcmask 261120  }
  0x75   : > { %768 = vst.msk [vmem:[#allocation2] sm:$0xff] %vm767_vm0, %v766_v0 }
  0x76 PF: > { %v2064_v1 = vld [vmem:[%s736_s20 + $0x8] sm:$0xff]  ;;  %v2063_v2 = vld [vmem:[%s736_s20] sm:$0xff]  ;;  %vm791_vm1 = vcmask 261120   ;;  %s2577_s10 = smov 104   ;;  %s2578_s12 = smov 120   ;;  %vm819_vm2 = vcmask 1047556  }
  0x77   : > { %801 = vmatpush.bf16.msra.mxu0 %v2064_v1  ;;  %v2231_v5 = vld [vmem:[%s739_s11] ss:$0 sm:$0xff]  ;;  %s2579_s26 = smov 112   ;;  %s2580_s16 = smov 96   ;;  %v2581_v15 = vmov 1983009808  }
  0x78   : > { %v824_v16 = vunpack.c.l.s4 %v2581_v15  ;;  %v2582_v29 = vmov 1934713408   ;;  %vm1185_vm3 = vcmask 64512   ;;  %s2583_s8 = smov 64   ;;  %vm1313_vm4 = vcmask 1043456   ;;  %s2584_s0 = smov 16  }
  0x79   : > { %v848_v30 = vunpack.c.l.s4 %v2582_v29  ;;  %s2585_s24 = smov 8   ;;  %s2586_s5 = smov 24   ;;  %vm1510_vm5 = vcmask 130048   ;;  %vm1512_vm6 = vcmask 195584   ;;  %vm1666_vm11 = vcmask 523264  }
  0x7a   : > { %v2947_v20 = vunpack.c.0.s8 %v824_v16  ;;  %s3326_s17 = scalar_lea.vmem [#allocation6], %s2872_s15  ;;  %s3328_s11 = scalar_lea.vmem [#allocation8], %s2872_s15 }
  0x7b   : > { %802 = vmatpush.bf16.msra.mxu0 %v2063_v2  ;;  %v2957_v35 = vunpack.c.0.s8 %v848_v30  ;;  %s3329_s20 = scalar_lea.vmem [#allocation11], %s2872_s15  ;;  %s3332_s21 = scalar_lea.vmem [#allocation9], %s2872_s15 }
  0x7c   : > { %v2934_v3 = vld [vmem:[#allocation2] sm:$0xff]  ;;  %s3333_s14 = sld [smem:[#allocation24_spill]] }
  0x7d   : > { %v770_v4 = vpack.c.bf16 %v2934_v3, %v2934_v3 }
  0x7f   : > { %2010 = vmatmul.msk.bf16.vlgmr.msra.gmra.mxu0 %vm791_vm1, %v770_v4 }
  0x82   : > { %p2054_p10 = scmp.ne.s32.totalorder %s3333_s14, 1 }
  0xfc   : > { %v804_v6 = vpop.f32.mrf.mxu0 }
  0xfd   : > { %v805_v7 = vadd.f32 %v2231_v5, %v804_v6 }
  0xff   : > { %815 = vrot.lane.b32.xlu1 %v805_v7, %s2577_s10  ;;  %809 = vrot.lane.b32.xlu0 %v805_v7, %s2578_s12  ;;  %v821_v17 = vrot.slane %v805_v7, 4 }
 0x104   : > { %v806_v8 = vpop.f32.mrf.mxu0 }
 0x107   : > { %812 = vrot.lane.b32.xlu0 %v805_v7, %s2579_s26 }
 0x171   : > { %v810_v9 = vpop.permute.xlu0 %809  ;;  %v816_v11 = vpop.permute.xlu1 %815 }
 0x172   : > { %v2939_v10 = vpack.i.bf16 %v810_v9, %v805_v7  ;;  %v831_v21 = vrot.slane %v816_v11, 4  ;;  %v833_v22 = vrot.slane %v810_v9, 4 }
 0x174   : > { %2212 = vrot.lane.b32.xlu1 %v2939_v10, %s2580_s16  ;;  %v832_v25 = vsel %vm819_vm2, %v831_v21, %v810_v9  ;;  %v834_v26 = vsel %vm819_vm2, %v816_v11, %v833_v22 }
 0x175   : > { %v838_v31 = vperm.slane %v832_v25, %v2947_v20  ;;  %v842_v32 = vperm.slane %v834_v26, %v2947_v20 }
 0x177   : > { %v843_v36 = vrot.slane %v838_v31, 4  ;;  %v855_v37 = vrot.slane %v842_v32, 4 }
 0x179   : > { %v813_v12 = vpop.permute.xlu0 %812 }
 0x17a   : > { %v2942_v13 = vpack.i.bf16 %v816_v11, %v813_v12  ;;  %v818_v14 = vrot.slane %v813_v12, 4  ;;  %v822_v19 = vsel %vm819_vm2, %v813_v12, %v821_v17 }
 0x17b   : > { %v830_v24 = vperm.slane %v822_v19, %v2947_v20 }
 0x17c   : > { %2217 = vrot.lane.b32.xlu2 %v2942_v13, %s2580_s16  ;;  %v820_v18 = vsel %vm819_vm2, %v818_v14, %v805_v7 }
 0x17d   : > { %v826_v23 = vperm.slane %v820_v18, %v2947_v20  ;;  %v857_v28 = vrot.slane %v830_v24, 4  ;;  %v856_v42 = vsel %vm819_vm2, %v855_v37, %v830_v24 }
 0x17e   : > { %v862_v46 = vperm.slane %v856_v42, %v2957_v35 }
 0x17f   : > { %v845_v27 = vrot.slane %v826_v23, 4  ;;  %v858_v34 = vsel %vm819_vm2, %v842_v32, %v857_v28  ;;  %v844_v41 = vsel %vm819_vm2, %v843_v36, %v826_v23 }
 0x180   : > { %v866_v39 = vperm.slane %v858_v34, %v2957_v35  ;;  %v850_v45 = vperm.slane %v844_v41, %v2957_v35  ;;  %v871_v56 = vrot.slane %v862_v46, 4 }
 0x181   : > { %v846_v33 = vsel %vm819_vm2, %v838_v31, %v845_v27 }
 0x182   : > { %v854_v38 = vperm.slane %v846_v33, %v2957_v35  ;;  %v873_v48 = vrot.slane %v866_v39, 4  ;;  %v867_v54 = vrot.slane %v850_v45, 4  ;;  %v872_v12 = vsel %vm819_vm2, 0.0, %v871_v56 }
 0x184   : > { %v869_v47 = vrot.slane %v854_v38, 4  ;;  %v874_v57 = vsel %vm819_vm2, 0.0, %v873_v48  ;;  %v886_v62 = vsel %vm819_vm2, %v873_v48, %v862_v46  ;;  %v868_v11 = vsel %vm819_vm2, 0.0, %v867_v54 }
 0x185   : > { %v891_v2 = vrot.slane %v874_v57, 4  ;;  %v890_v19 = vperm.slane %v886_v62, %v2947_v20 }
 0x186   : > { %v870_v55 = vsel %vm819_vm2, 0.0, %v869_v47  ;;  %v875_v14 = vsel %vm819_vm2, %v869_v47, %v850_v45 }
 0x187   : > { %v880_v1 = vrot.slane %v870_v55, 4  ;;  %v892_v24 = vsel %vm819_vm2, %v891_v2, %v872_v12  ;;  %v879_v27 = vperm.slane %v875_v14, %v2947_v20  ;;  %v911_v41 = vrot.slane %v890_v19, 4 }
 0x188   : > { %v896_v37 = vperm.slane %v892_v24, %v2947_v20 }
 0x189   : > { %v881_v23 = vsel %vm819_vm2, %v880_v1, %v868_v11 }
 0x18a   : > { %v885_v32 = vperm.slane %v881_v23, %v2947_v20 }
 0x1d6   : > { %v2218_v40 = vpop.permute.xlu2 %2217 }
 0x1d7   : > { %v2220_v43 = vunpack.i.h.bf16 %v2218_v40  ;;  %v2219_v44 = vunpack.i.l.bf16 %v2218_v40  ;;  %v899_v40 = vrot.slane %v879_v27, 4 }
 0x1d9   : > { %v957_v50 = vrot.slane %v2220_v43, 4  ;;  %v945_v51 = vrot.slane %v2219_v44, 4 }
 0x1e6   : > { %v2213_v49 = vpop.permute.xlu1 %2212 }
 0x1e7   : > { %v2215_v52 = vunpack.i.h.bf16 %v2213_v49  ;;  %v2214_v53 = vunpack.i.l.bf16 %v2213_v49  ;;  %v897_v49 = vrot.slane %v885_v32, 4 }
 0x1e9   : > { %v959_v58 = vrot.slane %v2215_v52, 4  ;;  %v946_v59 = vsel %vm819_vm2, %v945_v51, %v2214_v53  ;;  %v947_v60 = vrot.slane %v2214_v53, 4  ;;  %v958_v61 = vsel %vm819_vm2, %v957_v50, %v2215_v52 }
 0x1ea   : > { %v952_v63 = vperm.slane %v946_v59, %v2947_v20  ;;  %v964_v0 = vperm.slane %v958_v61, %v2947_v20  ;;  %v909_v53 = vrot.slane %v896_v37, 4  ;;  %v900_v59 = vsel %vm819_vm2, %v885_v32, %v899_v40 }
 0x1eb   : > { %v948_v4 = vsel %vm819_vm2, %v2219_v44, %v947_v60  ;;  %v960_v5 = vsel %vm819_vm2, %v2220_v43, %v959_v58  ;;  %v912_v61 = vsel %vm819_vm2, %v896_v37, %v911_v41  ;;  %v898_v62 = vsel %vm819_vm2, %v897_v49, %v879_v27 }
 0x1ec   : > { %v956_v6 = vperm.slane %v948_v4, %v2947_v20  ;;  %v968_v7 = vperm.slane %v960_v5, %v2947_v20  ;;  %v969_v8 = vrot.slane %v964_v0, 4  ;;  %v971_v9 = vrot.slane %v952_v63, 4 }
 0x1ed   : > { %v910_v2 = vsel %vm819_vm2, %v909_v53, %v890_v19  ;;  %v904_v11 = vperm.slane %v898_v62, %v2957_v35 }
 0x1ee   : > { %v970_v15 = vsel %vm819_vm2, %v969_v8, %v952_v63  ;;  %v972_v16 = vsel %vm819_vm2, %v964_v0, %v971_v9  ;;  %v981_v17 = vrot.slane %v968_v7, 4  ;;  %v983_v18 = vrot.slane %v956_v6, 4 }
 0x1ef   : > { %v976_v21 = vperm.slane %v970_v15, %v2957_v35  ;;  %v980_v22 = vperm.slane %v972_v16, %v2957_v35  ;;  %v920_v9 = vperm.slane %v912_v61, %v2957_v35 }
 0x1f0   : > { %v982_v25 = vsel %vm819_vm2, %v981_v17, %v956_v6  ;;  %v984_v26 = vsel %vm819_vm2, %v968_v7, %v983_v18  ;;  %v908_v7 = vperm.slane %v900_v59, %v2957_v35  ;;  %v916_v18 = vperm.slane %v910_v2, %v2957_v35 }
 0x1f1   : > { %v988_v28 = vperm.slane %v982_v25, %v2957_v35  ;;  %v992_v29 = vperm.slane %v984_v26, %v2957_v35  ;;  %v993_v30 = vrot.slane %v976_v21, 4  ;;  %v995_v31 = vrot.slane %v980_v22, 4 }
 0x1f2   : > { %v927_v23 = vrot.slane %v908_v7, 4 }
 0x1f3   : > { %v996_v33 = vsel %vm819_vm2, 0.0, %v995_v31  ;;  %v997_v34 = vrot.slane %v988_v28, 4  ;;  %v999_v36 = vrot.slane %v992_v29, 4  ;;  %v1001_v38 = vsel %vm819_vm2, %v995_v31, %v976_v21 }
 0x1f4   : > { %v1006_v39 = vrot.slane %v996_v33, 4  ;;  %v994_v42 = vsel %vm819_vm2, 0.0, %v993_v30  ;;  %v1005_v44 = vperm.slane %v1001_v38, %v2947_v20  ;;  %v925_v29 = vrot.slane %v920_v9, 4 }
 0x1f5   : > { %v1000_v43 = vsel %vm819_vm2, 0.0, %v999_v36  ;;  %v1012_v45 = vsel %vm819_vm2, %v999_v36, %v988_v28  ;;  %v998_v50 = vsel %vm819_vm2, 0.0, %v997_v34  ;;  %v923_v28 = vrot.slane %v904_v11, 4 }
 0x1f6   : > { %v1017_v46 = vrot.slane %v1000_v43, 4  ;;  %v1007_v47 = vsel %vm819_vm2, %v1006_v39, %v994_v42  ;;  %v1016_v48 = vperm.slane %v1012_v45, %v2947_v20  ;;  %v1025_v52 = vrot.slane %v1005_v44, 4 }
 0x1f7   : > { %v1011_v51 = vperm.slane %v1007_v47, %v2947_v20  ;;  %v928_v33 = vsel %vm819_vm2, %v920_v9, %v927_v23  ;;  %v921_v34 = vrot.slane %v916_v18, 4  ;;  %v924_v37 = vsel %vm819_vm2, %v916_v18, %v923_v28 }
 0x1f8   : > { %v1018_v54 = vsel %vm819_vm2, %v1017_v46, %v998_v50  ;;  %v1037_v55 = vrot.slane %v1016_v48, 4  ;;  %v926_v38 = vsel %vm819_vm2, %v925_v29, %v908_v7  ;;  %v932_v39 = vpack.c.bf16 %v928_v33, %v928_v33 }
 0x1f9   : > { %v1022_v56 = vperm.slane %v1018_v54, %v2947_v20  ;;  %v1026_v57 = vsel %vm819_vm2, %v1011_v51, %v1025_v52  ;;  %v1023_v58 = vrot.slane %v1011_v51, 4  ;;  %v922_v40 = vsel %vm819_vm2, %v921_v34, %v904_v11 }
 0x1fa   : > { %v1034_v60 = vperm.slane %v1026_v57, %v2957_v35  ;;  %v930_v41 = vpack.c.bf16 %v924_v37, %v924_v37  ;;  %v931_v42 = vpack.c.bf16 %v926_v38, %v926_v38  ;;  %v929_v43 = vpack.c.bf16 %v922_v40, %v922_v40 }
 0x1fb   : > { %v1038_v63 = vsel %vm819_vm2, %v1022_v56, %v1037_v55  ;;  %v1024_v0 = vsel %vm819_vm2, %v1023_v58, %v1005_v44  ;;  %v1035_v1 = vrot.slane %v1022_v56, 4 }
 0x1fc   : > { %v1046_v4 = vperm.slane %v1038_v63, %v2957_v35  ;;  %v1053_v5 = vrot.slane %v1034_v60, 4  ;;  %v1030_v6 = vperm.slane %v1024_v0, %v2957_v35 }
 0x1fd   : > { %v1036_v8 = vsel %vm819_vm2, %v1035_v1, %v1016_v48 }
 0x1fe   : > { %v1054_v12 = vsel %vm819_vm2, %v1046_v4, %v1053_v5  ;;  %v1042_v14 = vperm.slane %v1036_v8, %v2957_v35  ;;  %v1049_v15 = vrot.slane %v1030_v6, 4  ;;  %v1051_v16 = vrot.slane %v1046_v4, 4 }
 0x1ff   : > { %v1058_v17 = vpack.c.bf16 %v1054_v12, %v1054_v12 }
 0x200   : > { %v1050_v19 = vsel %vm819_vm2, %v1042_v14, %v1049_v15  ;;  %v1052_v21 = vsel %vm819_vm2, %v1051_v16, %v1034_v60  ;;  %v1047_v22 = vrot.slane %v1042_v14, 4 }
 0x201   : > { %v1247_v24 = vsel %vm1185_vm3, %v1058_v17, 0  ;;  %v1056_v25 = vpack.c.bf16 %v1050_v19, %v1050_v19  ;;  %v1057_v26 = vpack.c.bf16 %v1052_v21, %v1052_v21 }
 0x202   : > { %1256 = vmatpush.bf16.xpose.msrb.mxu0 %v1247_v24  ;;  %v1048_v27 = vsel %vm819_vm2, %v1047_v22, %v1030_v6 }
 0x203   : > { %v1209_v30 = vsel %vm1185_vm3, %v1056_v25, 0  ;;  %v1228_v31 = vsel %vm1185_vm3, %v1057_v26, 0  ;;  %v1055_v32 = vpack.c.bf16 %v1048_v27, %v1048_v27 }
 0x204   : > { %1218 = vmatpush.bf16.xpose.msra.mxu2 %v1209_v30  ;;  %1237 = vmatpush.bf16.xpose.msra.mxu3 %v1228_v31 }
 0x205   : > { %v1190_v36 = vsel %vm1185_vm3, %v1055_v32, 0 }
 0x206   : > { %1199 = vmatpush.bf16.xpose.msra.mxu1 %v1190_v36 }
 0x209   : > { %2014 = vmatmul.msk.bf16.vlgmr.msrb.gmra.mxu0 %vm1185_vm3, %v932_v39 }
 0x20b   : > { %2012 = vmatmul.msk.bf16.vlgmr.msra.gmra.mxu2 %vm1185_vm3, %v930_v41  ;;  %2013 = vmatmul.msk.bf16.vlgmr.msra.gmra.mxu3 %vm1185_vm3, %v931_v42 }
 0x20d   : > { %2011 = vmatmul.msk.bf16.vlgmr.msra.gmra.mxu1 %vm1185_vm3, %v929_v43 }
 0x286   : > { %v1258_v44 = vpop.f32.mrf.mxu0 }
 0x287   : > { %v1271_v45 = vsel %vm1185_vm3, %v1258_v44, -inf }
 0x288   : > { %1272 = vmax.xlane.f32.xlu2 %v1271_v45 }
 0x28a   : > { %v1201_v46 = vpop.f32.mrf.mxu1 }
 0x28b   : > { %v1262_v47 = vsel %vm1185_vm3, %v1201_v46, -inf }
 0x28c   : > { %1263 = vmax.xlane.f32.xlu1 %v1262_v47 }
 0x28e   : > { %v1220_v48 = vpop.f32.mrf.mxu2  ;;  %v1239_v49 = vpop.f32.mrf.mxu3 }
 0x28f   : > { %v1260_v50 = vpop.f32.mrf.mxu0  ;;  %v1268_v51 = vsel %vm1185_vm3, %v1239_v49, -inf  ;;  %v1265_v52 = vsel %vm1185_vm3, %v1220_v48, -inf }
 0x290   : > { %1269 = vmax.xlane.f32.xlu2 %v1268_v51  ;;  %1266 = vmax.xlane.f32.xlu0 %v1265_v52 }
 0x292   : > { %v1203_v53 = vpop.f32.mrf.mxu1 }
 0x296   : > { %v1222_v54 = vpop.f32.mrf.mxu2  ;;  %v1241_v55 = vpop.f32.mrf.mxu3 }
 0x2a4   : > { %2227 = vrot.lane.b32.xlu0 %v2942_v13, %s2583_s8 }
 0x2a8   : > { %2222 = vrot.lane.b32.xlu2 %v2939_v10, %s2583_s8 }
 0x2fb   : > { %v1273_v56 = vpop.xlane.xlu2 %1272 }
 0x2fc   : > { %v1277_v57 = vsub.f32 %v1258_v44, %v1273_v56 }
 0x2fe   : > { %v1284_v58 = vmul.f32 1.442695, %v1277_v57 }
 0x2ff   : > { %v1264_v13 = vpop.xlane.xlu1 %1263 }
 0x300   : > { %2239 = vpow2.f32 %v1284_v58  ;;  %v1274_v10 = vsub.f32 %v1201_v46, %v1264_v13 }
 0x302   : > { %v1278_v7 = vmul.f32 1.442695, %v1274_v10 }
 0x303   : > { %v1270_v59 = vpop.xlane.xlu2 %1269  ;;  %v1267_v60 = vpop.xlane.xlu0 %1266 }
 0x304   : > { %v1276_v61 = vsub.f32 %v1239_v49, %v1270_v59  ;;  %v1275_v0 = vsub.f32 %v1220_v48, %v1267_v60 }
 0x306   : > { %v3043_v62 = vpop.eup %2239  ;;  %v1282_v63 = vmul.f32 1.442695, %v1276_v61  ;;  %v1280_v2 = vmul.f32 1.442695, %v1275_v0 }
 0x307   : > { %v1295_v1 = vsel %vm1185_vm3, %v3043_v62, 0.0 }
 0x308   : > { %2241 = vpow2.f32 %v1282_v63  ;;  %1296 = vadd.xlane.f32.xlu0 %v1295_v1 }
 0x309   : > { %2243 = vpow2.f32 %v1280_v2 }
 0x30a   : > { %2245 = vpow2.f32 %v1278_v7 }
 0x30b   : > { %v2223_v5 = vpop.permute.xlu2 %2222 }
 0x30c   : > { %v2225_v8 = vunpack.i.h.bf16 %v2223_v5  ;;  %v2224_v9 = vunpack.i.l.bf16 %v2223_v5 }
 0x30e   : > { %v3047_v4 = vpop.eup %2241  ;;  %v1085_v12 = vrot.slane %v2225_v8, 4  ;;  %v1073_v15 = vrot.slane %v2224_v9, 4 }
 0x30f   : > { %v1292_v6 = vsel %vm1185_vm3, %v3047_v4, 0.0  ;;  %v3051_v11 = vpop.eup %2243 }
 0x310   : > { %1293 = vadd.xlane.f32.xlu1 %v1292_v6  ;;  %v1289_v18 = vsel %vm1185_vm3, %v3051_v11, 0.0  ;;  %v3061_v28 = vpop.eup %2245 }
 0x311   : > { %v1286_v40 = vsel %vm1185_vm3, %v3061_v28, 0.0 }
 0x316   : > { %v2228_v14 = vpop.permute.xlu0 %2227 }
 0x317   : > { %v2230_v16 = vunpack.i.h.bf16 %v2228_v14  ;;  %v2229_v17 = vunpack.i.l.bf16 %v2228_v14 }
 0x318   : > { %1290 = vadd.xlane.f32.xlu1 %v1289_v18 }
 0x319   : > { %v1083_v19 = vrot.slane %v2230_v16, 4  ;;  %v1086_v21 = vsel %vm819_vm2, %v2230_v16, %v1085_v12  ;;  %v1071_v22 = vrot.slane %v2229_v17, 4  ;;  %v1074_v23 = vsel %vm819_vm2, %v2229_v17, %v1073_v15 }
 0x31a   : > { %v1094_v24 = vperm.slane %v1086_v21, %v2947_v20  ;;  %v1082_v25 = vperm.slane %v1074_v23, %v2947_v20 }
 0x31b   : > { %v1084_v26 = vsel %vm819_vm2, %v1083_v19, %v2225_v8  ;;  %v1072_v27 = vsel %vm819_vm2, %v1071_v22, %v2224_v9 }
 0x31c   : > { %v1090_v29 = vperm.slane %v1084_v26, %v2947_v20  ;;  %v1107_v30 = vrot.slane %v1094_v24, 4  ;;  %v1078_v31 = vperm.slane %v1072_v27, %v2947_v20  ;;  %v1109_v32 = vrot.slane %v1082_v25, 4 }
 0x31e   : > { %v1095_v33 = vrot.slane %v1090_v29, 4  ;;  %v1097_v34 = vrot.slane %v1078_v31, 4  ;;  %v1108_v36 = vsel %vm819_vm2, %v1107_v30, %v1082_v25  ;;  %v1110_v37 = vsel %vm819_vm2, %v1094_v24, %v1109_v32 }
 0x31f   : > { %v1114_v38 = vperm.slane %v1108_v36, %v2957_v35  ;;  %v1118_v39 = vperm.slane %v1110_v37, %v2957_v35 }
 0x320   : > { %v1096_v41 = vsel %vm819_vm2, %v1095_v33, %v1078_v31  ;;  %v1098_v42 = vsel %vm819_vm2, %v1090_v29, %v1097_v34  ;;  %1287 = vadd.xlane.f32.xlu1 %v1286_v40 }
 0x321   : > { %v1102_v43 = vperm.slane %v1096_v41, %v2957_v35  ;;  %v1106_v44 = vperm.slane %v1098_v42, %v2957_v35  ;;  %v1123_v45 = vrot.slane %v1114_v38, 4  ;;  %v1125_v46 = vrot.slane %v1118_v39, 4 }
 0x323   : > { %v1119_v47 = vrot.slane %v1102_v43, 4  ;;  %v1121_v48 = vrot.slane %v1106_v44, 4  ;;  %v1126_v49 = vsel %vm819_vm2, 0.0, %v1125_v46  ;;  %v1138_v50 = vsel %vm819_vm2, %v1125_v46, %v1114_v38 }
 0x324   : > { %v1143_v51 = vrot.slane %v1126_v49, 4  ;;  %v1124_v53 = vsel %vm819_vm2, 0.0, %v1123_v45  ;;  %v1142_v55 = vperm.slane %v1138_v50, %v2947_v20 }
 0x325   : > { %v1122_v52 = vsel %vm819_vm2, 0.0, %v1121_v48  ;;  %v1127_v54 = vsel %vm819_vm2, %v1121_v48, %v1102_v43  ;;  %v1120_v59 = vsel %vm819_vm2, 0.0, %v1119_v47 }
 0x326   : > { %v1132_v56 = vrot.slane %v1122_v52, 4  ;;  %v1131_v57 = vperm.slane %v1127_v54, %v2947_v20  ;;  %v1144_v58 = vsel %vm819_vm2, %v1143_v51, %v1124_v53  ;;  %v1163_v61 = vrot.slane %v1142_v55, 4 }
 0x327   : > { %v1148_v60 = vperm.slane %v1144_v58, %v2947_v20 }
 0x328   : > { %v1133_v63 = vsel %vm819_vm2, %v1132_v56, %v1120_v59  ;;  %v1151_v0 = vrot.slane %v1131_v57, 4 }
 0x329   : > { %v1137_v1 = vperm.slane %v1133_v63, %v2947_v20  ;;  %v1164_v2 = vsel %vm819_vm2, %v1148_v60, %v1163_v61  ;;  %v1161_v13 = vrot.slane %v1148_v60, 4 }
 0x32a   : > { %v1172_v10 = vperm.slane %v1164_v2, %v2957_v35 }
 0x32b   : > { %v1152_v5 = vsel %vm819_vm2, %v1137_v1, %v1151_v0  ;;  %v1149_v6 = vrot.slane %v1137_v1, 4  ;;  %v1162_v7 = vsel %vm819_vm2, %v1161_v13, %v1142_v55 }
 0x32c   : > { %v1160_v8 = vperm.slane %v1152_v5, %v2957_v35  ;;  %v1177_v9 = vrot.slane %v1172_v10, 4  ;;  %v1168_v12 = vperm.slane %v1162_v7, %v2957_v35 }
 0x32d   : > { %v1150_v14 = vsel %vm819_vm2, %v1149_v6, %v1131_v57 }
 0x32e   : > { %v1178_v15 = vsel %vm819_vm2, %v1177_v9, %v1160_v8  ;;  %v1179_v16 = vrot.slane %v1160_v8, 4  ;;  %v1156_v17 = vperm.slane %v1150_v14, %v2957_v35  ;;  %v1173_v18 = vrot.slane %v1168_v12, 4 }
 0x32f   : > { %v1183_v19 = vpack.c.bf16 %v1178_v15, %v1178_v15 }
 0x330   : > { %v1174_v21 = vsel %vm819_vm2, %v1173_v18, %v1156_v17  ;;  %v1180_v22 = vsel %vm819_vm2, %v1172_v10, %v1179_v16  ;;  %v1175_v23 = vrot.slane %v1156_v17, 4 }
 0x331   : > { %v1353_v24 = vsel %vm1313_vm4, %v1183_v19, 0  ;;  %v1181_v25 = vpack.c.bf16 %v1174_v21, %v1174_v21  ;;  %v1184_v26 = vpack.c.bf16 %v1180_v22, %v1180_v22 }
 0x332   : > { %1362 = vmatpush.bf16.msrb.mxu3 %v1353_v24  ;;  %v1176_v27 = vsel %vm819_vm2, %v1168_v12, %v1175_v23 }
 0x333   : > { %v1315_v29 = vsel %vm1313_vm4, %v1181_v25, 0  ;;  %v1372_v30 = vsel %vm1313_vm4, %v1184_v26, 0  ;;  %v1182_v31 = vpack.c.bf16 %v1176_v27, %v1176_v27 }
 0x334   : > { %1324 = vmatpush.bf16.msrb.mxu1 %v1315_v29  ;;  %1381 = vmatpush.bf16.msra.mxu0 %v1372_v30 }
 0x335   : > { %v1334_v32 = vsel %vm1313_vm4, %v1182_v31, 0 }
 0x336   : > { %1343 = vmatpush.bf16.msrb.mxu2 %v1334_v32 }
 0x37b   : > { %v1297_v33 = vpop.xlane.xlu0 %1296 }
 0x37c   : > { %2247 = vrcp.f32 %v1297_v33 }
 0x382   : > { %v2248_v34 = vpop.eup %2247 }
 0x383   : > { %v1305_v36 = vmul.f32 %v2248_v34, %v3043_v62  ;;  %v1294_v37 = vpop.xlane.xlu1 %1293 }
 0x384   : > { %2249 = vrcp.f32 %v1294_v37 }
 0x385   : > { %v1309_v38 = vpack.c.bf16 %v1305_v36, %v1305_v36 }
 0x387   : > { %2018 = vmatmul.msk.bf16.vlgmr.msra.gmra.mxu0 %vm1185_vm3, %v1309_v38 }
 0x38a   : > { %v2250_v39 = vpop.eup %2249 }
 0x38b   : > { %v1304_v40 = vmul.f32 %v2250_v39, %v3047_v4  ;;  %v1291_v41 = vpop.xlane.xlu1 %1290 }
 0x38c   : > { %2251 = vrcp.f32 %v1291_v41 }
 0x38d   : > { %v1308_v42 = vpack.c.bf16 %v1304_v40, %v1304_v40 }
 0x38f   : > { %2017 = vmatmul.msk.bf16.vlgmr.msrb.gmra.mxu3 %vm1185_vm3, %v1308_v42 }
 0x392   : > { %v2252_v43 = vpop.eup %2251 }
 0x393   : > { %v1303_v44 = vmul.f32 %v2252_v43, %v3051_v11  ;;  %v1288_v45 = vpop.xlane.xlu1 %1287 }
 0x394   : > { %2253 = vrcp.f32 %v1288_v45 }
 0x395   : > { %v1307_v46 = vpack.c.bf16 %v1303_v44, %v1303_v44 }
 0x397   : > { %2016 = vmatmul.msk.bf16.vlgmr.msrb.gmra.mxu2 %vm1185_vm3, %v1307_v46 }
 0x39a   : > { %v2254_v62 = vpop.eup %2253 }
 0x39b   : > { %v1302_v47 = vmul.f32 %v2254_v62, %v3061_v28 }
 0x39d   : > { %v1306_v48 = vpack.c.bf16 %v1302_v47, %v1302_v47 }
 0x39f   : > { %2015 = vmatmul.msk.bf16.vlgmr.msrb.gmra.mxu1 %vm1185_vm3, %v1306_v48 }
 0x404   : > { %v1383_v4 = vpop.f32.mrf.mxu0 }
 0x405   : > { %v1399_v51 = vrot.slane %v1383_v4, 4 }
 0x40c   : > { %v1385_v49 = vpop.f32.mrf.mxu0 }
 0x412   : > { %v1364_v50 = vpop.f32.mrf.mxu3 }
 0x413   : > { %v1387_v54 = vrot.slane %v1364_v50, 4 }
 0x41a   : > { %v1345_v52 = vpop.f32.mrf.mxu2  ;;  %v1366_v53 = vpop.f32.mrf.mxu3 }
 0x41b   : > { %v1400_v11 = vsel %vm819_vm2, %v1399_v51, %v1345_v52  ;;  %v1401_v55 = vrot.slane %v1345_v52, 4 }
 0x41c   : > { %v1406_v56 = vperm.slane %v1400_v11, %v2947_v20  ;;  %v1326_v57 = vpop.f32.mrf.mxu1 }
 0x41d   : > { %v1402_v58 = vsel %vm819_vm2, %v1383_v4, %v1401_v55  ;;  %v1388_v28 = vsel %vm819_vm2, %v1387_v54, %v1326_v57  ;;  %v1389_v59 = vrot.slane %v1326_v57, 4  ;;  %v2065_v55 = vld [vmem:[%s2907_s13] sm:$0xff] }
 0x41e   : > { %v1410_v60 = vperm.slane %v1402_v58, %v2947_v20  ;;  %v1411_v61 = vrot.slane %v1406_v56, 4  ;;  %v1394_v63 = vperm.slane %v1388_v28, %v2947_v20 }
 0x41f   : > { %v1390_v0 = vsel %vm819_vm2, %v1364_v50, %v1389_v59 }
 0x420   : > { %v1423_v1 = vrot.slane %v1410_v60, 4  ;;  %v1398_v2 = vperm.slane %v1390_v0, %v2947_v20  ;;  %v1412_v13 = vsel %vm819_vm2, %v1411_v61, %v1394_v63  ;;  %v1413_v10 = vrot.slane %v1394_v63, 4  ;;  %v2232_v63 = vld [vmem:[%s3326_s17] ss:$0 sm:$0xff] }
 0x421   : > { %v1418_v5 = vperm.slane %v1412_v13, %v2957_v35 }
 0x422   : > { %v1414_v6 = vsel %vm819_vm2, %v1406_v56, %v1413_v10  ;;  %v1424_v7 = vsel %vm819_vm2, %v1423_v1, %v1398_v2  ;;  %v1425_v8 = vrot.slane %v1398_v2, 4  ;;  %v1347_v9 = vpop.f32.mrf.mxu2 }
 0x423   : > { %v1422_v12 = vperm.slane %v1414_v6, %v2957_v35  ;;  %v1430_v14 = vperm.slane %v1424_v7, %v2957_v35  ;;  %v1435_v18 = vrot.slane %v1418_v5, 4 }
 0x424   : > { %v1426_v15 = vsel %vm819_vm2, %v1410_v60, %v1425_v8  ;;  %v1328_v16 = vpop.f32.mrf.mxu1 }
 0x425   : > { %v1434_v17 = vperm.slane %v1426_v15, %v2957_v35  ;;  %v1437_v19 = vrot.slane %v1422_v12, 4  ;;  %v1439_v22 = vrot.slane %v1430_v14, 4  ;;  %v1436_v27 = vsel %vm819_vm2, 0.0, %v1435_v18 }
 0x427   : > { %v1438_v21 = vsel %vm819_vm2, 0.0, %v1437_v19  ;;  %v1441_v23 = vrot.slane %v1434_v17, 4  ;;  %v1443_v24 = vsel %vm819_vm2, %v1437_v19, %v1418_v5  ;;  %v1440_v34 = vsel %vm819_vm2, 0.0, %v1439_v22  ;;  %v2068_v19 = vld [vmem:[%s2920_s22 + $0x8] sm:$0xff]  ;;  %v2072_v22 = vld [vmem:[%s2926_s25 + $0x18] sm:$0xff] }
 0x428   : > { %v1448_v25 = vrot.slane %v1438_v21, 4  ;;  %v1447_v26 = vperm.slane %v1443_v24, %v2947_v20  ;;  %v2587_v5 = vmov 32.0   ;;  %1621 = vmatpush.bf16.msra.mxu2 %v2068_v19  ;;  %v2067_v21 = vld [vmem:[%s2920_s22] sm:$0xff]  ;;  %1674 = vmatpush.bf16.msra.mxu3 %v2072_v22 }
 0x429   : > { %v1442_v29 = vsel %vm819_vm2, 0.0, %v1441_v23  ;;  %v1454_v30 = vsel %vm819_vm2, %v1441_v23, %v1430_v14  ;;  %2255 = vrcp.f32 %v2587_v5 }
 0x42a   : > { %v1459_v31 = vrot.slane %v1442_v29, 4  ;;  %v1449_v32 = vsel %vm819_vm2, %v1448_v25, %v1436_v27  ;;  %v1458_v33 = vperm.slane %v1454_v30, %v2947_v20  ;;  %v1467_v37 = vrot.slane %v1447_v26, 4  ;;  %v2071_v25 = vld [vmem:[%s2926_s25 + $0x10] sm:$0xff] }
 0x42b   : > { %v1453_v36 = vperm.slane %v1449_v32, %v2947_v20 }
 0x42c   : > { %v1460_v38 = vsel %vm819_vm2, %v1459_v31, %v1440_v34  ;;  %v1479_v39 = vrot.slane %v1458_v33, 4  ;;  %1622 = vmatpush.bf16.msra.mxu2 %v2067_v21  ;;  %1675 = vmatpush.bf16.msra.mxu3 %v2071_v25  ;;  %v2233_v34 = vld [vmem:[%s747_s6] ss:$0 sm:$0xff]  ;;  %s3330_s6 = scalar_lea.vmem [#allocation12], %s2872_s15 }
 0x42d   : > { %v1464_v40 = vperm.slane %v1460_v38, %v2947_v20  ;;  %v1465_v41 = vrot.slane %v1453_v36, 4  ;;  %v1468_v42 = vsel %vm819_vm2, %v1453_v36, %v1467_v37  ;;  %v2234_v37 = vld [vmem:[%s3328_s11] ss:$0 sm:$0xff] }
 0x42e   : > { %v1476_v48 = vperm.slane %v1468_v42, %v2957_v35  ;;  %v2070_v42 = vld [vmem:[%s2926_s25 + $0x8] sm:$0xff] }
 0x42f   : > { %v1480_v43 = vsel %vm819_vm2, %v1464_v40, %v1479_v39  ;;  %v1466_v44 = vsel %vm819_vm2, %v1465_v41, %v1447_v26  ;;  %v1477_v45 = vrot.slane %v1464_v40, 4  ;;  %v2256_v6 = vpop.eup %2255 }
 0x430   : > { %v1488_v46 = vperm.slane %v1480_v43, %v2957_v35  ;;  %v1472_v62 = vperm.slane %v1466_v44, %v2957_v35  ;;  %v1495_v54 = vrot.slane %v1476_v48, 4  ;;  %v1558_v7 = vmul.f32 32.0, %v2256_v6  ;;  %1676 = vmatpush.bf16.msra.mxu3 %v2070_v42  ;;  %v2069_v43 = vld [vmem:[%s2926_s25] sm:$0xff] }
 0x431   : > { %v1478_v47 = vsel %vm819_vm2, %v1477_v45, %v1458_v33  ;;  %vm1562_vm7 = vweird.f32 %v2256_v6  ;;  %v2235_v44 = vld [vmem:[%s3329_s20] ss:$0 sm:$0xff] }
 0x432   : > { %v1493_v4 = vrot.slane %v1488_v46, 4  ;;  %v1484_v20 = vperm.slane %v1478_v47, %v2957_v35  ;;  %v1491_v49 = vrot.slane %v1472_v62, 4  ;;  %v1496_v11 = vsel %vm819_vm2, %v1488_v46, %v1495_v54  ;;  %v2066_v35 = vld [vmem:[%s2907_s13 + $0x8] sm:$0xff] }
 0x433   : > { %1544 = vmatpush.bf16.msra.mxu1 %v2066_v35  ;;  %v1559_v8 = vsub.f32 1.0, %v1558_v7 }
 0x434   : > { %v1494_v50 = vsel %vm819_vm2, %v1493_v4, %v1476_v48  ;;  %v1489_v51 = vrot.slane %v1484_v20, 4  ;;  %v1492_v52 = vsel %vm819_vm2, %v1484_v20, %v1491_v49  ;;  %1677 = vmatpush.bf16.msra.mxu3 %v2069_v43  ;;  %v2236_v4 = vld [vmem:[%s3330_s6] ss:$0 sm:$0xff] }
 0x435   : > { %1502 = vrot.lane.b32.xlu1 %v1494_v50, %s2584_s0  ;;  %1498 = vrot.lane.b32.xlu2 %v1492_v52, %s2585_s24  ;;  %v1560_v9 = vmul.f32 %v2256_v6, %v1559_v8 }
 0x436   : > { %v1490_v53 = vsel %vm819_vm2, %v1489_v51, %v1472_v62 }
 0x437   : > { %1545 = vmatpush.bf16.msra.mxu1 %v2065_v55  ;;  %v1561_v12 = vadd.f32 %v2256_v6, %v1560_v9 }
 0x439   : > { %v1563_v14 = vsel %vm1562_vm7, %v2256_v6, %v1561_v12 }
 0x43d   : > { %1506 = vrot.lane.b32.xlu2 %v1496_v11, %s2586_s5 }
 0x48f   : > { %v1499_v56 = vpop.permute.xlu2 %1498 }
 0x490   : > { %v1509_v57 = vsel %vm1185_vm3, %v1490_v53, %v1499_v56 }
 0x497   : > { %v1507_v28 = vpop.permute.xlu2 %1506 }
 0x4a7   : > { %v1503_v58 = vpop.permute.xlu1 %1502 }
 0x4a8   : > { %v1511_v59 = vsel %vm1510_vm5, %v1509_v57, %v1503_v58 }
 0x4a9   : > { %v1513_v60 = vsel %vm1512_vm6, %v1511_v59, %v1507_v28 }
 0x4aa   : > { %v1514_v61 = vpack.c.bf16 %v1513_v60, %v1513_v60 }
 0x4ac   : > { %2027 = vmatmul.msk.bf16.vlgmr.msra.gmra.mxu1 %vm791_vm1, %v1514_v61 }
 0x529   : > { %v1547_v0 = vpop.f32.mrf.mxu1 }
 0x52a   : > { %v1548_v1 = vadd.f32 %v2232_v63, %v1547_v0 }
 0x52c   : > { %v1551_v2 = vadd.f32 %v1548_v1, %v2934_v3  ;;  %v2237_v1 = vld [vmem:[%s750_s29] ss:$0 sm:$0xff] }
 0x52e   : > { %v1554_v13 = vsel %vm791_vm1, %v1551_v2, 0.0 }
 0x52f   : > { %1555 = vadd.xlane.f32.xlu2 %v1554_v13  ;;  %v2238_v13 = vld [vmem:[%s3332_s21] ss:$0 sm:$0xff] }
 0x531   : > { %v1549_v10 = vpop.f32.mrf.mxu1 }
 0x5a2   : > { %v1556_v15 = vpop.xlane.xlu2 %1555 }
 0x5a3   : > { %v1564_v16 = vmul.f32 %v1563_v14, %v1556_v15 }
 0x5a5   : > { %v1565_v3 = vsub.f32 %v1551_v2, %v1564_v16 }
 0x5a7   : > { %v1566_v17 = vmul.f32 %v1565_v3, %v1565_v3 }
 0x5a9   : > { %v1567_v18 = vsel %vm791_vm1, %v1566_v17, 0.0 }
 0x5aa   : > { %1568 = vadd.xlane.f32.xlu1 %v1567_v18 }
 0x61d   : > { %v1569_v23 = vpop.xlane.xlu1 %1568 }
 0x61e   : > { %v1570_v24 = vmul.f32 %v1569_v23, %v1563_v14 }
 0x620   : > { %v1571_v26 = vadd.f32 1e-05, %v1570_v24 }
 0x622   : > { %2257 = vrsqrt.f32 %v1571_v26  ;;  %vm1578_vm9 = vweird.f32 %v1571_v26 }
 0x628   : > { %v2258_v27 = vpop.eup %2257 }
 0x629   : > { %v1573_v29 = vmul.f32 %v2258_v27, %v1571_v26  ;;  %vm1579_vm8 = vweird.f32 %v2258_v27 }
 0x62a   : > { %vm1580_vm10 = vmor %vm1578_vm9, %vm1579_vm8 }
 0x62b   : > { %v1574_v30 = vmul.f32 %v2258_v27, %v1573_v29 }
 0x62d   : > { %v1575_v31 = vmul.f32 0.5, %v1574_v30 }
 0x62f   : > { %v1576_v32 = vsub.f32 1.5, %v1575_v31 }
 0x631   : > { %v1577_v33 = vmul.f32 %v2258_v27, %v1576_v32 }
 0x633   : > { %v1581_v36 = vsel %vm1580_vm10, %v2258_v27, %v1577_v33 }
 0x634   : > { %v1582_v38 = vmul.f32 %v1581_v36, %v1565_v3 }
 0x636   : > { %v1586_v39 = vmul.f32 %v2233_v34, %v1582_v38 }
 0x638   : > { %v1590_v40 = vadd.f32 %v2234_v37, %v1586_v39 }
 0x63a   : > { %v1591_v41 = vpack.c.bf16 %v1590_v40, %v1590_v40 }
 0x63c   : > { %2036 = vmatmul.msk.bf16.vlgmr.msra.gmra.mxu2 %vm791_vm1, %v1591_v41 }
 0x6bf   : > { %v1624_v45 = vpop.f32.mrf.mxu2 }
 0x6c0   : > { %v1625_v46 = vadd.f32 %v2235_v44, %v1624_v45 }
 0x6c2   : > { %v1628_v62 = vmax.f32 %v1625_v46, 0.0 }
 0x6c4   : > { %v1629_v47 = vpack.c.bf16 %v1628_v62, %v1628_v62 }
 0x6c6   : > { %2053 = vmatmul.msk.bf16.vlgmr.msra.gmra.mxu3 %vm1666_vm11, %v1629_v47 }
 0x6c7   : > { %v1626_v48 = vpop.f32.mrf.mxu2 }
 0x749   : > { %v1679_v20 = vpop.f32.mrf.mxu3 }
 0x74a   : > { %v1680_v49 = vadd.f32 %v2236_v4, %v1679_v20 }
 0x74c   : > { %v1683_v50 = vadd.f32 %v1680_v49, %v1590_v40 }
 0x74e   : > { %v1686_v51 = vsel %vm791_vm1, %v1683_v50, 0.0 }
 0x74f   : > { %1687 = vadd.xlane.f32.xlu0 %v1686_v51 }
 0x751   : > { %v1681_v52 = vpop.f32.mrf.mxu3 }
 0x7c2   : > { %v1688_v53 = vpop.xlane.xlu0 %1687 }
 0x7c3   : > { %v1689_v54 = vmul.f32 %v1688_v53, %v1563_v14 }
 0x7c5   : > { %v1690_v11 = vsub.f32 %v1683_v50, %v1689_v54 }
 0x7c7   : > { %v1691_v35 = vmul.f32 %v1690_v11, %v1690_v11 }
 0x7c9   : > { %v1692_v55 = vsel %vm791_vm1, %v1691_v35, 0.0 }
 0x7ca   : > { %1693 = vadd.xlane.f32.xlu0 %v1692_v55 }
 0x83d   : > { %v1694_v56 = vpop.xlane.xlu0 %1693 }
 0x83e   : > { %v1695_v57 = vmul.f32 %v1694_v56, %v1563_v14 }
 0x840   : > { %v1696_v58 = vadd.f32 1e-05, %v1695_v57 }
 0x842   : > { %2259 = vrsqrt.f32 %v1696_v58  ;;  %vm1703_vm13 = vweird.f32 %v1696_v58 }
 0x848   : > { %v2260_v28 = vpop.eup %2259 }
 0x849   : > { %v1698_v59 = vmul.f32 %v2260_v28, %v1696_v58  ;;  %vm1704_vm12 = vweird.f32 %v2260_v28 }
 0x84a   : > { %vm1705_vm14 = vmor %vm1703_vm13, %vm1704_vm12 }
 0x84b   : > { %v1699_v60 = vmul.f32 %v2260_v28, %v1698_v59 }
 0x84d   : > { %v1700_v61 = vmul.f32 0.5, %v1699_v60 }
 0x84f   : > { %v1701_v63 = vsub.f32 1.5, %v1700_v61 }
 0x851   : > { %v1702_v0 = vmul.f32 %v2260_v28, %v1701_v63 }
 0x853   : > { %v1706_v2 = vsel %vm1705_vm14, %v2260_v28, %v1702_v0 }
 0x854   : > { %v1707_v10 = vmul.f32 %v1706_v2, %v1690_v11 }
 0x856   : > { %v1711_v5 = vmul.f32 %v2237_v1, %v1707_v10  ;;  %1720 = sbr.rel (%p2054_p10) target bundleno = 2147 (0x863), region = 104 }
 0x858   : > { %v1715_v6 = vadd.f32 %v2238_v13, %v1711_v5 }
 0x85a   : > { %1716 = vst.msk [vmem:[#allocation2] sm:$0xff] %vm791_vm1, %v1715_v6 }
 0x861   : > { %v1721_v7 = vld [vmem:[#allocation2] sm:$0xff] }
 0x862   : > { %1722 = vst.msk [vmem:[%s2930_s23] sm:$0xff] %vm791_vm1, %v1721_v7 }
 0x863 PF: > { %s3334_s19 = sld [smem:[#allocation25_spill]]  ;;  %s1736_s12 = sshll.u32 %s2930_s23, 4  ;;  %s1737_s12 = int_to_ptr.vmem [resolvable:$true] %s1736_s12 }
 0x864   : > { %s3335_s25 = sld [smem:[#allocation47_spill]]  ;;  %s1724_s16 = scalar_lea.sflag [#allocation5], %s2858_s3 }
 0x869   : > { %s2056_s29 = sshll.u32 %s3334_s19, 3 }
 0x86a   : > { %s3336_s1 = smov %s3335_s25  ;;  %s1734_s10 = scalar_lea.hbm %s3335_s25, %s2056_s29 }
 0x86b   : > { %s1738_s26 = sshll.u32 %s1734_s10, 4  ;;  %s2461_s17 = scalar_lea.hbm %s3336_s1, 16  ;;  %s1739_s26 = int_to_ptr.hbm [resolvable:$true] %s1738_s26 }
 0x86c   : > { %s2455_s8 = sshra.s32 %s1739_s26, 4  ;;  %s2456_s8 = int_to_ptr.hbm [resolvable:$true] %s2455_s8 }
 0x86d   : > { %s2457_s0 = scalar_lea.hbm %s2456_s8, 8  ;;  %p2462_p0 = scmp.lt.s32.totalorder %s2456_s8, %s3336_s1 }
 0x86e   : > { %p2458_p11 = scmp.ne.s32.totalorder %s2456_s8, %s2457_s0  ;;  %p2463_p5 = scmp.lt.s32.totalorder %s2461_s17, %s2457_s0 }
 0x870   : > { %p2459_p1 = pnand %p2458_p11, %p2811_p12  ;;  %p2464_p6 = por %p2463_p5, %p2462_p0 }
 0x872   : > { %p2460_p3 = pneg %p2459_p1 }
 0x874   : > { %p2465_p8 = pnand %p2464_p6, %p2460_p3 }
 0x876   : > { %2468 = shalt.err (!%p2465_p8)
}
 0x877   : > { %2085 = dma.vmem_to_hbm [thread:$0]  (%p2811_p12), %s1737_s12, 128, %s1739_s26, %s1724_s16  }
 0x878 PF: > { %p2111_p9 = scmp.ge.s32.totalorder %s2575_s18, 2  ;;  %s1750_s23 = sand.u32 1, %s2547_s28  }
 0x879   : > { %s1751_s7 = scalar_lea.sflag [#allocation5], %s1750_s23 }
 0x87a   : > { %p2107_p2 = pnand %p2111_p9, %p2820_p13 }
 0x87c   : > { %p2108_p4 = pneg %p2107_p2 }
 0x87e   : > { %2530 = dma.done.wait (%p2108_p4), %s1751_s7, 128  }
 0x87f   : > { %2532 = vsyncadd (%p2108_p4), %s1751_s7, 4294967168  ;;  %s38_s18 = sadd.s32 1, %s2575_s18   ;;  %s3338_s25 = sld [smem:[#allocation20_spill]] }
 0x880   : > { %p35_p7 = scmp.ge.s32.totalorder %s38_s18, 6   ;;  %s3339_s26 = sld [smem:[#allocation21_spill]] }
 0x881   : > { %s3340_s27 = sld [smem:[#allocation31_spill]] }
 0x882   : > { %s3341_s28 = sld [smem:[#allocation22_spill]] }
 0x883   : > { %s3342_s29 = sld [smem:[#allocation23_spill]] }
 0x884   : > { %s3343_s30 = sld [smem:[#allocation32_spill]]  ;;  %37 = sbr.rel (!%p35_p7) target bundleno = 30 (0x1e), region = 207 }
 0x885   : > { %s3344_s14 = sld [smem:[#allocation26_spill]] }
 0x886   : > { %s3345_s15 = sld [smem:[#allocation27_spill]] }
 0x887   : > { %s3346_s16 = sld [smem:[#allocation28_spill]] }
 0x888   : > { %s3347_s17 = sld [smem:[#allocation29_spill]] }
 0x889   :  { %1757 = vsyncpa [#allocation4], 1 }
 0x88a   :  { %1759 = vsyncpa [#allocation4 + $0x1], 1 }
 0x88b   :  { %1760 = vsyncpa [#allocation7], 1 }
 0x88c   :  { %1762 = vsyncpa [#allocation7 + $0x1], 1 }
 0x88d   :  { %1763 = vsyncpa [#allocation10], 1 }
 0x88e   :  { %1765 = vsyncpa [#allocation10 + $0x1], 1 }
 0x88f   :  { %1766 = vsyncpa [#allocation13], 1 }
 0x890   :  { %1768 = vsyncpa [#allocation13 + $0x1], 1 }
 0x891   :  { %1769 = vsyncpa [#allocation5], 1 }
 0x892   :  { %1771 = vsyncpa [#allocation5 + $0x1], 1 }

</bundles_post_ra>
